<compile_context>
chip_gen: v7x
topology: tpu7x:2x2x1
jax: 0.10.0
libtpu: 0.0.40
codegen_flags: <defaults>
</compile_context>

<pallas_src>
import math

import jax
import jax.numpy as jnp
from jax import lax
from jax.experimental import pallas as pl
from jax.experimental.pallas import tpu as pltpu


# ----------------------------- fused kernel --------------------------------
def _make_fused_kernel(S, B, H, Hp, L):
    """Build the fused forward kernel for static shapes.

    S: seq len, B: batch, H: real rnn_out, Hp: padded hidden (128),
    L: dim_label_in.
    """
    inv_sqrt_h = 1.0 / math.sqrt(H)   # PyTorch scales by sqrt(seq.shape[-1]) = sqrt(H)
    G = 3 * Hp

    def kernel(x_ref, meta_ref, lab_ref, wx_ref, wh_ref, wvqk_ref, b_ref,
               wlat_ref, wmeta_ref, wlab_ref, bout_ref, out_ref):
        f32 = jnp.float32
        b_all = b_ref[...]                       # [3, 3*Hp]
        bi = b_all[0:1, :]                       # (b_ir+b_hr | b_iz+b_hz | b_in)
        bh = b_all[1:2, :]                       # (0 | 0 | b_hn)
        bvqk = b_all[2:3, :]                     # (b_v | b_q | b_k)

        # ---- GRU: hoisted input projection (one matmul for all timesteps) ----
        x_proj = jnp.dot(x_ref[...], wx_ref[...],
                         preferred_element_type=f32) + bi       # [S*B, 3*Hp]
        wh = wh_ref[...]                                         # [Hp, 3*Hp]

        h = jnp.zeros((B, Hp), f32)
        hs = []
        # Fully unrolled time recurrence (S is static & small): gives the
        # scheduler visibility across steps; only jnp.dot(h, wh) is serial.
        for t in range(S):
            gx = x_proj[t * B:(t + 1) * B, :]                    # [B, 3*Hp]
            gh = jnp.dot(h, wh, preferred_element_type=f32) + bh  # [B, 3*Hp]
            r = jax.nn.sigmoid(gx[:, 0:Hp] + gh[:, 0:Hp])
            z = jax.nn.sigmoid(gx[:, Hp:2 * Hp] + gh[:, Hp:2 * Hp])
            n = jnp.tanh(gx[:, 2 * Hp:G] + r * gh[:, 2 * Hp:G])
            h = (1.0 - z) * n + z * h                            # pad cols stay 0
            hs.append(h)

        # ---- TransformerAttn + sum over sequence (whole batch, one program) ----
        wvqk = wvqk_ref[...]                                     # [Hp, 3*Hp]
        sums = []
        for b in range(B):
            x_b = jnp.concatenate([hh[b:b + 1, :] for hh in hs], axis=0)  # [S, Hp]
            vqk = jnp.dot(x_b, wvqk, preferred_element_type=f32) + bvqk   # [S, 3*Hp]
            v = vqk[:, 0:Hp]
            q = vqk[:, Hp:2 * Hp]
            k = vqk[:, 2 * Hp:G]
            w = jnp.einsum("sd,td->st", v, q,
                           preferred_element_type=f32) * inv_sqrt_h       # [S, S]
            w = w - jnp.max(w, axis=-1, keepdims=True)
            w = jnp.exp(w)
            w = w * pl.reciprocal(jnp.sum(w, axis=-1, keepdims=True), approx=True)
            ctx = jnp.dot(w, k, preferred_element_type=f32)               # [S, Hp]
            sums.append(jnp.sum(ctx, axis=0, keepdims=True))              # [1, Hp]
        lat_sum = jnp.concatenate(sums, axis=0)                           # [B, Hp]

        # ---- output Linear + Tanh on cat([latent_sum, metadata, labels]) ----
        pre = (jnp.dot(lat_sum, wlat_ref[...], preferred_element_type=f32)
               + jnp.dot(meta_ref[...], wmeta_ref[...], preferred_element_type=f32)
               + bout_ref[...])
        if L == 1:
            pre = pre + lab_ref[...] * wlab_ref[...]              # [B,1]*[1,O]
        else:
            pre = pre + jnp.dot(lab_ref[...], wlab_ref[...],
                                preferred_element_type=f32)
        out_ref[...] = jnp.tanh(pre)

    return kernel


def _full_spec(shape):
    n = len(shape)
    return pl.BlockSpec(shape, lambda i, _n=n: (0,) * _n)


def make_forward(S, B, D, H, M, L, O, Hp=128):
    """Returns a jitted forward(seqs, metadata, labels, packed_params)."""
    kernel = _make_fused_kernel(S, B, H, Hp, L)
    G = 3 * Hp

    @jax.jit
    def forward(seqs, metadata, labels, packed):
        x_flat = seqs.reshape(S * B, D)          # free (layout-preserving)
        return pl.pallas_call(
            kernel,
            out_shape=jax.ShapeDtypeStruct((B, O), jnp.float32),
            grid=(1,),
            in_specs=[
                _full_spec((S * B, D)),
                _full_spec((B, M)),
                _full_spec((B, L)),
                _full_spec((D, G)),
                _full_spec((Hp, G)),
                _full_spec((Hp, G)),
                _full_spec((3, G)),
                _full_spec((Hp, O)),
                _full_spec((M, O)),
                _full_spec((L, O)),
                _full_spec((1, O)),
            ],
            out_specs=_full_spec((B, O)),
            compiler_params=pltpu.CompilerParams(
                dimension_semantics=("arbitrary",)),
        )(x_flat, metadata, labels,
          packed["w_x"], packed["w_h"], packed["w_vqk"], packed["b_pack"],
          packed["w_lat"], packed["w_meta"], packed["w_lab"], packed["b_out"])

    return forward


# ------------------------- parameter packing --------------------------------
def pack_params(raw, dim_metadata, dim_label_in, Hp=128):
    """Pack/pad raw parameters into the fused, 128-lane-per-gate layout."""
    g, a = raw["gru"], raw["attn"]
    D, H = g["wir"].shape
    O = raw["out_w"].shape[1]
    G = 3 * Hp
    f32 = jnp.float32

    def gate_cols(ws):                      # list of [in, H] -> [in, 3*Hp]
        in_dim = ws[0].shape[0]
        out = jnp.zeros((in_dim, G), f32)
        for i, w in enumerate(ws):
            out = out.at[:, i * Hp:i * Hp + H].set(w)
        return out

    def pad_rows(w):                        # [H, X] -> [Hp, X]
        return jnp.zeros((Hp, w.shape[1]), f32).at[:H, :].set(w)

    w_x = gate_cols([g["wir"], g["wiz"], g["win"]])                 # [D, 3Hp]
    w_h = pad_rows(gate_cols([g["whr"], g["whz"], g["whn"]]))       # [Hp, 3Hp]
    w_vqk = pad_rows(gate_cols([a["wv"], a["wq"], a["wk"]]))        # [Hp, 3Hp]

    bi = gate_cols([g["br"], g["bz"], g["bin"]])                    # [1, 3Hp]
    bh = gate_cols([jnp.zeros_like(g["br"]), jnp.zeros_like(g["bz"]), g["bhn"]])
    bvqk = gate_cols([a["bv"], a["bq"], a["bk"]])
    b_pack = jnp.concatenate([bi, bh, bvqk], axis=0)                # [3, 3Hp]

    M, L = dim_metadata, dim_label_in
    w_lat = jnp.zeros((Hp, O), f32).at[:H, :].set(raw["out_w"][:H])
    w_meta = raw["out_w"][H:H + M]
    w_lab = raw["out_w"][H + M:H + M + L]
    return dict(w_x=w_x, w_h=w_h, w_vqk=w_vqk, b_pack=b_pack,
                w_lat=w_lat, w_meta=w_meta, w_lab=w_lab, b_out=raw["out_b"])


# ------------------------------ reference ----------------------------------
def reference_forward(seqs, metadata, labels, params):
    g = params["gru"]
    H = g["whr"].shape[0]

    def step(h, x):
        r = jax.nn.sigmoid(x @ g["wir"] + h @ g["whr"] + g["br"])
        z = jax.nn.sigmoid(x @ g["wiz"] + h @ g["whz"] + g["bz"])
        n = jnp.tanh(x @ g["win"] + g["bin"] + r * (h @ g["whn"] + g["bhn"]))
        h_new = (1.0 - z) * n + z * h
        return h_new, h_new

    h0 = jnp.zeros((seqs.shape[1], H), jnp.float32)
    _, lat = lax.scan(step, h0, seqs)                          # [S, B, H]

    a = params["attn"]
    x = jnp.transpose(lat, (1, 0, 2))                          # [B, S, H]
    value = x @ a["wv"] + a["bv"]
    query = x @ a["wq"] + a["bq"]
    keys = x @ a["wk"] + a["bk"]
    w = jnp.einsum("bsh,bth->bst", value, query) / math.sqrt(H)
    w = jax.nn.softmax(w, axis=-1)
    ctx = jnp.einsum("bst,bth->bsh", w, keys)
    latent_sum = jnp.sum(ctx, axis=1)                          # [B, H]

    cat = jnp.concatenate([latent_sum, metadata, labels], axis=1)
    return jnp.tanh(cat @ params["out_w"] + params["out_b"])


# -------------------------------- params -----------------------------------
def init_params(key, dim_seq_in, dim_label_in, dim_metadata, rnn_out, dim_out):
    H = rnn_out
    ks = list(jax.random.split(key, 20))
    u = lambda k, shape, bound: jax.random.uniform(
        k, shape, jnp.float32, -bound, bound)
    kg = 1.0 / math.sqrt(H)
    gru = dict(
        wir=u(ks[0], (dim_seq_in, H), kg), wiz=u(ks[1], (dim_seq_in, H), kg),
        win=u(ks[2], (dim_seq_in, H), kg),
        whr=u(ks[3], (H, H), kg), whz=u(ks[4], (H, H), kg), whn=u(ks[5], (H, H), kg),
        br=u(ks[6], (1, H), kg), bz=u(ks[7], (1, H), kg),
        bin=u(ks[8], (1, H), kg), bhn=u(ks[9], (1, H), kg),
    )
    ka = 1.0 / math.sqrt(H)
    attn = dict(
        wv=u(ks[10], (H, H), ka), bv=u(ks[11], (1, H), ka),
        wq=u(ks[12], (H, H), ka), bq=u(ks[13], (1, H), ka),
        wk=u(ks[14], (H, H), ka), bk=u(ks[15], (1, H), ka),
    )
    fin = H + dim_metadata + dim_label_in
    ko = 1.0 / math.sqrt(fin)
    out_w = u(ks[16], (fin, dim_out), ko)
    out_b = u(ks[17], (1, dim_out), ko)
    return dict(gru=gru, attn=attn, out_w=out_w, out_b=out_b)


if __name__ == "__main__":
    # Module defaults: dim_seq_in=5, dim_label_in=1, dim_metadata=3,
    # rnn_out=40, dim_out=50, n_layers=1, bidirectional=False.
    S, B = 8, 2
    dim_seq_in, dim_label_in, dim_metadata = 5, 1, 3
    rnn_out, dim_out = 40, 50
    Hp = 128   # per-gate lane-padded hidden width

    key = jax.random.PRNGKey(0)
    kp, ks, km, kl = jax.random.split(key, 4)
    raw = init_params(kp, dim_seq_in, dim_label_in, dim_metadata, rnn_out, dim_out)
    packed = pack_params(raw, dim_metadata, dim_label_in, Hp)

    seqs = jax.random.normal(ks, (S, B, dim_seq_in), jnp.float32)
    metadata = jax.random.normal(km, (B, dim_metadata), jnp.float32)
    labels = jax.random.normal(kl, (B, dim_label_in), jnp.float32)

    forward = make_forward(S, B, dim_seq_in, rnn_out, dim_metadata,
                           dim_label_in, dim_out, Hp)
    out = jax.block_until_ready(forward(seqs, metadata, labels, packed))
    assert out.shape == (B, dim_out), out.shape

    ref = jax.block_until_ready(reference_forward(seqs, metadata, labels, raw))
    # Tolerance tightened vs 2e-2; only expected drift is the EUP approximate
    # reciprocal in the softmax denominator (~1e-3 relative worst case).
    if not jnp.allclose(out, ref, atol=5e-3, rtol=5e-3):
        raise AssertionError(
            f"mismatch: max abs err = {float(jnp.max(jnp.abs(out - ref)))}")

    print("KERNEL_OK")
</pallas_src>

<mosaic_0001>
module attributes {stable_mosaic.version = 11 : i64} {
  func.func @kernel(%arg0: i32, %arg1: memref<16x5xf32, #tpu.memory_space<vmem>>, %arg2: memref<2x3xf32, #tpu.memory_space<vmem>>, %arg3: memref<2x1xf32, #tpu.memory_space<vmem>>, %arg4: memref<5x384xf32, #tpu.memory_space<vmem>>, %arg5: memref<128x384xf32, #tpu.memory_space<vmem>>, %arg6: memref<128x384xf32, #tpu.memory_space<vmem>>, %arg7: memref<3x384xf32, #tpu.memory_space<vmem>>, %arg8: memref<128x50xf32, #tpu.memory_space<vmem>>, %arg9: memref<3x50xf32, #tpu.memory_space<vmem>>, %arg10: memref<1x50xf32, #tpu.memory_space<vmem>>, %arg11: memref<1x50xf32, #tpu.memory_space<vmem>>, %arg12: memref<2x50xf32, #tpu.memory_space<vmem>>) attributes {dimension_semantics = [#tpu.dimension_semantics<arbitrary>], iteration_bounds = array<i64: 1>, scalar_prefetch = 0 : i64, scratch_operands = 0 : i64, tpu.core_type = #tpu.core_type<tc>, window_params = [{pipeline_mode = #tpu.pipeline_mode<synchronous>, transform_indices = @transform_0, window_bounds = array<i64: 16, 5>}, {pipeline_mode = #tpu.pipeline_mode<synchronous>, transform_indices = @transform_1, window_bounds = array<i64: 2, 3>}, {pipeline_mode = #tpu.pipeline_mode<synchronous>, transform_indices = @transform_2, window_bounds = array<i64: 2, 1>}, {pipeline_mode = #tpu.pipeline_mode<synchronous>, transform_indices = @transform_3, window_bounds = array<i64: 5, 384>}, {pipeline_mode = #tpu.pipeline_mode<synchronous>, transform_indices = @transform_4, window_bounds = array<i64: 128, 384>}, {pipeline_mode = #tpu.pipeline_mode<synchronous>, transform_indices = @transform_5, window_bounds = array<i64: 128, 384>}, {pipeline_mode = #tpu.pipeline_mode<synchronous>, transform_indices = @transform_6, window_bounds = array<i64: 3, 384>}, {pipeline_mode = #tpu.pipeline_mode<synchronous>, transform_indices = @transform_7, window_bounds = array<i64: 128, 50>}, {pipeline_mode = #tpu.pipeline_mode<synchronous>, transform_indices = @transform_8, window_bounds = array<i64: 3, 50>}, {pipeline_mode = #tpu.pipeline_mode<synchronous>, transform_indices = @transform_9, window_bounds = array<i64: 1, 50>}, {pipeline_mode = #tpu.pipeline_mode<synchronous>, transform_indices = @transform_10, window_bounds = array<i64: 1, 50>}, {pipeline_mode = #tpu.pipeline_mode<synchronous>, transform_indices = @transform_11, window_bounds = array<i64: 2, 50>}]} {
    %c0 = arith.constant 0 : index
    %c0_0 = arith.constant 0 : index
    %0 = vector.load %arg7[%c0, %c0_0] : memref<3x384xf32, #tpu.memory_space<vmem>>, vector<3x384xf32>
    %1 = vector.extract_strided_slice %0 {offsets = [0, 0], sizes = [1, 384], strides = [1, 1]} : vector<3x384xf32> to vector<1x384xf32>
    %2 = vector.extract_strided_slice %0 {offsets = [1, 0], sizes = [1, 384], strides = [1, 1]} : vector<3x384xf32> to vector<1x384xf32>
    %3 = vector.extract_strided_slice %0 {offsets = [2, 0], sizes = [1, 384], strides = [1, 1]} : vector<3x384xf32> to vector<1x384xf32>
    %c0_1 = arith.constant 0 : index
    %c0_2 = arith.constant 0 : index
    %4 = vector.load %arg1[%c0_1, %c0_2] : memref<16x5xf32, #tpu.memory_space<vmem>>, vector<16x5xf32>
    %c0_3 = arith.constant 0 : index
    %c0_4 = arith.constant 0 : index
    %5 = vector.load %arg4[%c0_3, %c0_4] : memref<5x384xf32, #tpu.memory_space<vmem>>, vector<5x384xf32>
    %cst = arith.constant dense<0.000000e+00> : vector<16x384xf32>
    %6 = tpu.matmul %4, %5, %cst {dimension_numbers = #tpu.dot_dimension_numbers<[1], [0], [0], [1], [0, 0, 1, 1], [], []>} : vector<16x5xf32>, vector<5x384xf32>, vector<16x384xf32> -> vector<16x384xf32>
    %7 = vector.broadcast %1 : vector<1x384xf32> to vector<16x384xf32>
    %8 = arith.addf %6, %7 : vector<16x384xf32>
    %c0_5 = arith.constant 0 : index
    %c0_6 = arith.constant 0 : index
    %9 = vector.load %arg5[%c0_5, %c0_6] : memref<128x384xf32, #tpu.memory_space<vmem>>, vector<128x384xf32>
    %cst_7 = arith.constant 0.000000e+00 : f32
    %10 = vector.broadcast %cst_7 : f32 to vector<2x128xf32>
    %11 = vector.extract_strided_slice %8 {offsets = [0, 0], sizes = [2, 384], strides = [1, 1]} : vector<16x384xf32> to vector<2x384xf32>
    %cst_8 = arith.constant dense<0.000000e+00> : vector<2x384xf32>
    %12 = tpu.matmul %10, %9, %cst_8 {dimension_numbers = #tpu.dot_dimension_numbers<[1], [0], [0], [1], [0, 0, 1, 1], [], []>} : vector<2x128xf32>, vector<128x384xf32>, vector<2x384xf32> -> vector<2x384xf32>
    %13 = vector.broadcast %2 : vector<1x384xf32> to vector<2x384xf32>
    %14 = arith.addf %12, %13 : vector<2x384xf32>
    %15 = vector.extract_strided_slice %11 {offsets = [0, 0], sizes = [2, 128], strides = [1, 1]} : vector<2x384xf32> to vector<2x128xf32>
    %16 = vector.extract_strided_slice %14 {offsets = [0, 0], sizes = [2, 128], strides = [1, 1]} : vector<2x384xf32> to vector<2x128xf32>
    %17 = arith.addf %15, %16 : vector<2x128xf32>
    %18 = arith.negf %17 : vector<2x128xf32>
    %19 = math.exp %18 : vector<2x128xf32>
    %cst_9 = arith.constant 1.000000e+00 : f32
    %20 = vector.broadcast %cst_9 : f32 to vector<2x128xf32>
    %21 = arith.addf %20, %19 : vector<2x128xf32>
    %22 = arith.divf %20, %21 : vector<2x128xf32>
    %23 = vector.extract_strided_slice %11 {offsets = [0, 128], sizes = [2, 128], strides = [1, 1]} : vector<2x384xf32> to vector<2x128xf32>
    %24 = vector.extract_strided_slice %14 {offsets = [0, 128], sizes = [2, 128], strides = [1, 1]} : vector<2x384xf32> to vector<2x128xf32>
    %25 = arith.addf %23, %24 : vector<2x128xf32>
    %26 = arith.negf %25 : vector<2x128xf32>
    %27 = math.exp %26 : vector<2x128xf32>
    %cst_10 = arith.constant 1.000000e+00 : f32
    %28 = vector.broadcast %cst_10 : f32 to vector<2x128xf32>
    %29 = arith.addf %28, %27 : vector<2x128xf32>
    %30 = arith.divf %28, %29 : vector<2x128xf32>
    %31 = vector.extract_strided_slice %11 {offsets = [0, 256], sizes = [2, 128], strides = [1, 1]} : vector<2x384xf32> to vector<2x128xf32>
    %32 = vector.extract_strided_slice %14 {offsets = [0, 256], sizes = [2, 128], strides = [1, 1]} : vector<2x384xf32> to vector<2x128xf32>
    %33 = arith.mulf %22, %32 : vector<2x128xf32>
    %34 = arith.addf %31, %33 : vector<2x128xf32>
    %35 = math.tanh %34 : vector<2x128xf32>
    %cst_11 = arith.constant 1.000000e+00 : f32
    %36 = vector.broadcast %cst_11 : f32 to vector<2x128xf32>
    %37 = arith.subf %36, %30 : vector<2x128xf32>
    %38 = arith.mulf %37, %35 : vector<2x128xf32>
    %39 = arith.mulf %30, %10 : vector<2x128xf32>
    %40 = arith.addf %38, %39 : vector<2x128xf32>
    %41 = vector.extract_strided_slice %8 {offsets = [2, 0], sizes = [2, 384], strides = [1, 1]} : vector<16x384xf32> to vector<2x384xf32>
    %cst_12 = arith.constant dense<0.000000e+00> : vector<2x384xf32>
    %42 = tpu.matmul %40, %9, %cst_12 {dimension_numbers = #tpu.dot_dimension_numbers<[1], [0], [0], [1], [0, 0, 1, 1], [], []>} : vector<2x128xf32>, vector<128x384xf32>, vector<2x384xf32> -> vector<2x384xf32>
    %43 = vector.broadcast %2 : vector<1x384xf32> to vector<2x384xf32>
    %44 = arith.addf %42, %43 : vector<2x384xf32>
    %45 = vector.extract_strided_slice %41 {offsets = [0, 0], sizes = [2, 128], strides = [1, 1]} : vector<2x384xf32> to vector<2x128xf32>
    %46 = vector.extract_strided_slice %44 {offsets = [0, 0], sizes = [2, 128], strides = [1, 1]} : vector<2x384xf32> to vector<2x128xf32>
    %47 = arith.addf %45, %46 : vector<2x128xf32>
    %48 = arith.negf %47 : vector<2x128xf32>
    %49 = math.exp %48 : vector<2x128xf32>
    %cst_13 = arith.constant 1.000000e+00 : f32
    %50 = vector.broadcast %cst_13 : f32 to vector<2x128xf32>
    %51 = arith.addf %50, %49 : vector<2x128xf32>
    %52 = arith.divf %50, %51 : vector<2x128xf32>
    %53 = vector.extract_strided_slice %41 {offsets = [0, 128], sizes = [2, 128], strides = [1, 1]} : vector<2x384xf32> to vector<2x128xf32>
    %54 = vector.extract_strided_slice %44 {offsets = [0, 128], sizes = [2, 128], strides = [1, 1]} : vector<2x384xf32> to vector<2x128xf32>
    %55 = arith.addf %53, %54 : vector<2x128xf32>
    %56 = arith.negf %55 : vector<2x128xf32>
    %57 = math.exp %56 : vector<2x128xf32>
    %cst_14 = arith.constant 1.000000e+00 : f32
    %58 = vector.broadcast %cst_14 : f32 to vector<2x128xf32>
    %59 = arith.addf %58, %57 : vector<2x128xf32>
    %60 = arith.divf %58, %59 : vector<2x128xf32>
    %61 = vector.extract_strided_slice %41 {offsets = [0, 256], sizes = [2, 128], strides = [1, 1]} : vector<2x384xf32> to vector<2x128xf32>
    %62 = vector.extract_strided_slice %44 {offsets = [0, 256], sizes = [2, 128], strides = [1, 1]} : vector<2x384xf32> to vector<2x128xf32>
    %63 = arith.mulf %52, %62 : vector<2x128xf32>
    %64 = arith.addf %61, %63 : vector<2x128xf32>
    %65 = math.tanh %64 : vector<2x128xf32>
    %cst_15 = arith.constant 1.000000e+00 : f32
    %66 = vector.broadcast %cst_15 : f32 to vector<2x128xf32>
    %67 = arith.subf %66, %60 : vector<2x128xf32>
    %68 = arith.mulf %67, %65 : vector<2x128xf32>
    %69 = arith.mulf %60, %40 : vector<2x128xf32>
    %70 = arith.addf %68, %69 : vector<2x128xf32>
    %71 = vector.extract_strided_slice %8 {offsets = [4, 0], sizes = [2, 384], strides = [1, 1]} : vector<16x384xf32> to vector<2x384xf32>
    %cst_16 = arith.constant dense<0.000000e+00> : vector<2x384xf32>
    %72 = tpu.matmul %70, %9, %cst_16 {dimension_numbers = #tpu.dot_dimension_numbers<[1], [0], [0], [1], [0, 0, 1, 1], [], []>} : vector<2x128xf32>, vector<128x384xf32>, vector<2x384xf32> -> vector<2x384xf32>
    %73 = vector.broadcast %2 : vector<1x384xf32> to vector<2x384xf32>
    %74 = arith.addf %72, %73 : vector<2x384xf32>
    %75 = vector.extract_strided_slice %71 {offsets = [0, 0], sizes = [2, 128], strides = [1, 1]} : vector<2x384xf32> to vector<2x128xf32>
    %76 = vector.extract_strided_slice %74 {offsets = [0, 0], sizes = [2, 128], strides = [1, 1]} : vector<2x384xf32> to vector<2x128xf32>
    %77 = arith.addf %75, %76 : vector<2x128xf32>
    %78 = arith.negf %77 : vector<2x128xf32>
    %79 = math.exp %78 : vector<2x128xf32>
    %cst_17 = arith.constant 1.000000e+00 : f32
    %80 = vector.broadcast %cst_17 : f32 to vector<2x128xf32>
    %81 = arith.addf %80, %79 : vector<2x128xf32>
    %82 = arith.divf %80, %81 : vector<2x128xf32>
    %83 = vector.extract_strided_slice %71 {offsets = [0, 128], sizes = [2, 128], strides = [1, 1]} : vector<2x384xf32> to vector<2x128xf32>
    %84 = vector.extract_strided_slice %74 {offsets = [0, 128], sizes = [2, 128], strides = [1, 1]} : vector<2x384xf32> to vector<2x128xf32>
    %85 = arith.addf %83, %84 : vector<2x128xf32>
    %86 = arith.negf %85 : vector<2x128xf32>
    %87 = math.exp %86 : vector<2x128xf32>
    %cst_18 = arith.constant 1.000000e+00 : f32
    %88 = vector.broadcast %cst_18 : f32 to vector<2x128xf32>
    %89 = arith.addf %88, %87 : vector<2x128xf32>
    %90 = arith.divf %88, %89 : vector<2x128xf32>
    %91 = vector.extract_strided_slice %71 {offsets = [0, 256], sizes = [2, 128], strides = [1, 1]} : vector<2x384xf32> to vector<2x128xf32>
    %92 = vector.extract_strided_slice %74 {offsets = [0, 256], sizes = [2, 128], strides = [1, 1]} : vector<2x384xf32> to vector<2x128xf32>
    %93 = arith.mulf %82, %92 : vector<2x128xf32>
    %94 = arith.addf %91, %93 : vector<2x128xf32>
    %95 = math.tanh %94 : vector<2x128xf32>
    %cst_19 = arith.constant 1.000000e+00 : f32
    %96 = vector.broadcast %cst_19 : f32 to vector<2x128xf32>
    %97 = arith.subf %96, %90 : vector<2x128xf32>
    %98 = arith.mulf %97, %95 : vector<2x128xf32>
    %99 = arith.mulf %90, %70 : vector<2x128xf32>
    %100 = arith.addf %98, %99 : vector<2x128xf32>
    %101 = vector.extract_strided_slice %8 {offsets = [6, 0], sizes = [2, 384], strides = [1, 1]} : vector<16x384xf32> to vector<2x384xf32>
    %cst_20 = arith.constant dense<0.000000e+00> : vector<2x384xf32>
    %102 = tpu.matmul %100, %9, %cst_20 {dimension_numbers = #tpu.dot_dimension_numbers<[1], [0], [0], [1], [0, 0, 1, 1], [], []>} : vector<2x128xf32>, vector<128x384xf32>, vector<2x384xf32> -> vector<2x384xf32>
    %103 = vector.broadcast %2 : vector<1x384xf32> to vector<2x384xf32>
    %104 = arith.addf %102, %103 : vector<2x384xf32>
    %105 = vector.extract_strided_slice %101 {offsets = [0, 0], sizes = [2, 128], strides = [1, 1]} : vector<2x384xf32> to vector<2x128xf32>
    %106 = vector.extract_strided_slice %104 {offsets = [0, 0], sizes = [2, 128], strides = [1, 1]} : vector<2x384xf32> to vector<2x128xf32>
    %107 = arith.addf %105, %106 : vector<2x128xf32>
    %108 = arith.negf %107 : vector<2x128xf32>
    %109 = math.exp %108 : vector<2x128xf32>
    %cst_21 = arith.constant 1.000000e+00 : f32
    %110 = vector.broadcast %cst_21 : f32 to vector<2x128xf32>
    %111 = arith.addf %110, %109 : vector<2x128xf32>
    %112 = arith.divf %110, %111 : vector<2x128xf32>
    %113 = vector.extract_strided_slice %101 {offsets = [0, 128], sizes = [2, 128], strides = [1, 1]} : vector<2x384xf32> to vector<2x128xf32>
    %114 = vector.extract_strided_slice %104 {offsets = [0, 128], sizes = [2, 128], strides = [1, 1]} : vector<2x384xf32> to vector<2x128xf32>
    %115 = arith.addf %113, %114 : vector<2x128xf32>
    %116 = arith.negf %115 : vector<2x128xf32>
    %117 = math.exp %116 : vector<2x128xf32>
    %cst_22 = arith.constant 1.000000e+00 : f32
    %118 = vector.broadcast %cst_22 : f32 to vector<2x128xf32>
    %119 = arith.addf %118, %117 : vector<2x128xf32>
    %120 = arith.divf %118, %119 : vector<2x128xf32>
    %121 = vector.extract_strided_slice %101 {offsets = [0, 256], sizes = [2, 128], strides = [1, 1]} : vector<2x384xf32> to vector<2x128xf32>
    %122 = vector.extract_strided_slice %104 {offsets = [0, 256], sizes = [2, 128], strides = [1, 1]} : vector<2x384xf32> to vector<2x128xf32>
    %123 = arith.mulf %112, %122 : vector<2x128xf32>
    %124 = arith.addf %121, %123 : vector<2x128xf32>
    %125 = math.tanh %124 : vector<2x128xf32>
    %cst_23 = arith.constant 1.000000e+00 : f32
    %126 = vector.broadcast %cst_23 : f32 to vector<2x128xf32>
    %127 = arith.subf %126, %120 : vector<2x128xf32>
    %128 = arith.mulf %127, %125 : vector<2x128xf32>
    %129 = arith.mulf %120, %100 : vector<2x128xf32>
    %130 = arith.addf %128, %129 : vector<2x128xf32>
    %131 = vector.extract_strided_slice %8 {offsets = [8, 0], sizes = [2, 384], strides = [1, 1]} : vector<16x384xf32> to vector<2x384xf32>
    %cst_24 = arith.constant dense<0.000000e+00> : vector<2x384xf32>
    %132 = tpu.matmul %130, %9, %cst_24 {dimension_numbers = #tpu.dot_dimension_numbers<[1], [0], [0], [1], [0, 0, 1, 1], [], []>} : vector<2x128xf32>, vector<128x384xf32>, vector<2x384xf32> -> vector<2x384xf32>
    %133 = vector.broadcast %2 : vector<1x384xf32> to vector<2x384xf32>
    %134 = arith.addf %132, %133 : vector<2x384xf32>
    %135 = vector.extract_strided_slice %131 {offsets = [0, 0], sizes = [2, 128], strides = [1, 1]} : vector<2x384xf32> to vector<2x128xf32>
    %136 = vector.extract_strided_slice %134 {offsets = [0, 0], sizes = [2, 128], strides = [1, 1]} : vector<2x384xf32> to vector<2x128xf32>
    %137 = arith.addf %135, %136 : vector<2x128xf32>
    %138 = arith.negf %137 : vector<2x128xf32>
    %139 = math.exp %138 : vector<2x128xf32>
    %cst_25 = arith.constant 1.000000e+00 : f32
    %140 = vector.broadcast %cst_25 : f32 to vector<2x128xf32>
    %141 = arith.addf %140, %139 : vector<2x128xf32>
    %142 = arith.divf %140, %141 : vector<2x128xf32>
    %143 = vector.extract_strided_slice %131 {offsets = [0, 128], sizes = [2, 128], strides = [1, 1]} : vector<2x384xf32> to vector<2x128xf32>
    %144 = vector.extract_strided_slice %134 {offsets = [0, 128], sizes = [2, 128], strides = [1, 1]} : vector<2x384xf32> to vector<2x128xf32>
    %145 = arith.addf %143, %144 : vector<2x128xf32>
    %146 = arith.negf %145 : vector<2x128xf32>
    %147 = math.exp %146 : vector<2x128xf32>
    %cst_26 = arith.constant 1.000000e+00 : f32
    %148 = vector.broadcast %cst_26 : f32 to vector<2x128xf32>
    %149 = arith.addf %148, %147 : vector<2x128xf32>
    %150 = arith.divf %148, %149 : vector<2x128xf32>
    %151 = vector.extract_strided_slice %131 {offsets = [0, 256], sizes = [2, 128], strides = [1, 1]} : vector<2x384xf32> to vector<2x128xf32>
    %152 = vector.extract_strided_slice %134 {offsets = [0, 256], sizes = [2, 128], strides = [1, 1]} : vector<2x384xf32> to vector<2x128xf32>
    %153 = arith.mulf %142, %152 : vector<2x128xf32>
    %154 = arith.addf %151, %153 : vector<2x128xf32>
    %155 = math.tanh %154 : vector<2x128xf32>
    %cst_27 = arith.constant 1.000000e+00 : f32
    %156 = vector.broadcast %cst_27 : f32 to vector<2x128xf32>
    %157 = arith.subf %156, %150 : vector<2x128xf32>
    %158 = arith.mulf %157, %155 : vector<2x128xf32>
    %159 = arith.mulf %150, %130 : vector<2x128xf32>
    %160 = arith.addf %158, %159 : vector<2x128xf32>
    %161 = vector.extract_strided_slice %8 {offsets = [10, 0], sizes = [2, 384], strides = [1, 1]} : vector<16x384xf32> to vector<2x384xf32>
    %cst_28 = arith.constant dense<0.000000e+00> : vector<2x384xf32>
    %162 = tpu.matmul %160, %9, %cst_28 {dimension_numbers = #tpu.dot_dimension_numbers<[1], [0], [0], [1], [0, 0, 1, 1], [], []>} : vector<2x128xf32>, vector<128x384xf32>, vector<2x384xf32> -> vector<2x384xf32>
    %163 = vector.broadcast %2 : vector<1x384xf32> to vector<2x384xf32>
    %164 = arith.addf %162, %163 : vector<2x384xf32>
    %165 = vector.extract_strided_slice %161 {offsets = [0, 0], sizes = [2, 128], strides = [1, 1]} : vector<2x384xf32> to vector<2x128xf32>
    %166 = vector.extract_strided_slice %164 {offsets = [0, 0], sizes = [2, 128], strides = [1, 1]} : vector<2x384xf32> to vector<2x128xf32>
    %167 = arith.addf %165, %166 : vector<2x128xf32>
    %168 = arith.negf %167 : vector<2x128xf32>
    %169 = math.exp %168 : vector<2x128xf32>
    %cst_29 = arith.constant 1.000000e+00 : f32
    %170 = vector.broadcast %cst_29 : f32 to vector<2x128xf32>
    %171 = arith.addf %170, %169 : vector<2x128xf32>
    %172 = arith.divf %170, %171 : vector<2x128xf32>
    %173 = vector.extract_strided_slice %161 {offsets = [0, 128], sizes = [2, 128], strides = [1, 1]} : vector<2x384xf32> to vector<2x128xf32>
    %174 = vector.extract_strided_slice %164 {offsets = [0, 128], sizes = [2, 128], strides = [1, 1]} : vector<2x384xf32> to vector<2x128xf32>
    %175 = arith.addf %173, %174 : vector<2x128xf32>
    %176 = arith.negf %175 : vector<2x128xf32>
    %177 = math.exp %176 : vector<2x128xf32>
    %cst_30 = arith.constant 1.000000e+00 : f32
    %178 = vector.broadcast %cst_30 : f32 to vector<2x128xf32>
    %179 = arith.addf %178, %177 : vector<2x128xf32>
    %180 = arith.divf %178, %179 : vector<2x128xf32>
    %181 = vector.extract_strided_slice %161 {offsets = [0, 256], sizes = [2, 128], strides = [1, 1]} : vector<2x384xf32> to vector<2x128xf32>
    %182 = vector.extract_strided_slice %164 {offsets = [0, 256], sizes = [2, 128], strides = [1, 1]} : vector<2x384xf32> to vector<2x128xf32>
    %183 = arith.mulf %172, %182 : vector<2x128xf32>
    %184 = arith.addf %181, %183 : vector<2x128xf32>
    %185 = math.tanh %184 : vector<2x128xf32>
    %cst_31 = arith.constant 1.000000e+00 : f32
    %186 = vector.broadcast %cst_31 : f32 to vector<2x128xf32>
    %187 = arith.subf %186, %180 : vector<2x128xf32>
    %188 = arith.mulf %187, %185 : vector<2x128xf32>
    %189 = arith.mulf %180, %160 : vector<2x128xf32>
    %190 = arith.addf %188, %189 : vector<2x128xf32>
    %191 = vector.extract_strided_slice %8 {offsets = [12, 0], sizes = [2, 384], strides = [1, 1]} : vector<16x384xf32> to vector<2x384xf32>
    %cst_32 = arith.constant dense<0.000000e+00> : vector<2x384xf32>
    %192 = tpu.matmul %190, %9, %cst_32 {dimension_numbers = #tpu.dot_dimension_numbers<[1], [0], [0], [1], [0, 0, 1, 1], [], []>} : vector<2x128xf32>, vector<128x384xf32>, vector<2x384xf32> -> vector<2x384xf32>
    %193 = vector.broadcast %2 : vector<1x384xf32> to vector<2x384xf32>
    %194 = arith.addf %192, %193 : vector<2x384xf32>
    %195 = vector.extract_strided_slice %191 {offsets = [0, 0], sizes = [2, 128], strides = [1, 1]} : vector<2x384xf32> to vector<2x128xf32>
    %196 = vector.extract_strided_slice %194 {offsets = [0, 0], sizes = [2, 128], strides = [1, 1]} : vector<2x384xf32> to vector<2x128xf32>
    %197 = arith.addf %195, %196 : vector<2x128xf32>
    %198 = arith.negf %197 : vector<2x128xf32>
    %199 = math.exp %198 : vector<2x128xf32>
    %cst_33 = arith.constant 1.000000e+00 : f32
    %200 = vector.broadcast %cst_33 : f32 to vector<2x128xf32>
    %201 = arith.addf %200, %199 : vector<2x128xf32>
    %202 = arith.divf %200, %201 : vector<2x128xf32>
    %203 = vector.extract_strided_slice %191 {offsets = [0, 128], sizes = [2, 128], strides = [1, 1]} : vector<2x384xf32> to vector<2x128xf32>
    %204 = vector.extract_strided_slice %194 {offsets = [0, 128], sizes = [2, 128], strides = [1, 1]} : vector<2x384xf32> to vector<2x128xf32>
    %205 = arith.addf %203, %204 : vector<2x128xf32>
    %206 = arith.negf %205 : vector<2x128xf32>
    %207 = math.exp %206 : vector<2x128xf32>
    %cst_34 = arith.constant 1.000000e+00 : f32
    %208 = vector.broadcast %cst_34 : f32 to vector<2x128xf32>
    %209 = arith.addf %208, %207 : vector<2x128xf32>
    %210 = arith.divf %208, %209 : vector<2x128xf32>
    %211 = vector.extract_strided_slice %191 {offsets = [0, 256], sizes = [2, 128], strides = [1, 1]} : vector<2x384xf32> to vector<2x128xf32>
    %212 = vector.extract_strided_slice %194 {offsets = [0, 256], sizes = [2, 128], strides = [1, 1]} : vector<2x384xf32> to vector<2x128xf32>
    %213 = arith.mulf %202, %212 : vector<2x128xf32>
    %214 = arith.addf %211, %213 : vector<2x128xf32>
    %215 = math.tanh %214 : vector<2x128xf32>
    %cst_35 = arith.constant 1.000000e+00 : f32
    %216 = vector.broadcast %cst_35 : f32 to vector<2x128xf32>
    %217 = arith.subf %216, %210 : vector<2x128xf32>
    %218 = arith.mulf %217, %215 : vector<2x128xf32>
    %219 = arith.mulf %210, %190 : vector<2x128xf32>
    %220 = arith.addf %218, %219 : vector<2x128xf32>
    %221 = vector.extract_strided_slice %8 {offsets = [14, 0], sizes = [2, 384], strides = [1, 1]} : vector<16x384xf32> to vector<2x384xf32>
    %cst_36 = arith.constant dense<0.000000e+00> : vector<2x384xf32>
    %222 = tpu.matmul %220, %9, %cst_36 {dimension_numbers = #tpu.dot_dimension_numbers<[1], [0], [0], [1], [0, 0, 1, 1], [], []>} : vector<2x128xf32>, vector<128x384xf32>, vector<2x384xf32> -> vector<2x384xf32>
    %223 = vector.broadcast %2 : vector<1x384xf32> to vector<2x384xf32>
    %224 = arith.addf %222, %223 : vector<2x384xf32>
    %225 = vector.extract_strided_slice %221 {offsets = [0, 0], sizes = [2, 128], strides = [1, 1]} : vector<2x384xf32> to vector<2x128xf32>
    %226 = vector.extract_strided_slice %224 {offsets = [0, 0], sizes = [2, 128], strides = [1, 1]} : vector<2x384xf32> to vector<2x128xf32>
    %227 = arith.addf %225, %226 : vector<2x128xf32>
    %228 = arith.negf %227 : vector<2x128xf32>
    %229 = math.exp %228 : vector<2x128xf32>
    %cst_37 = arith.constant 1.000000e+00 : f32
    %230 = vector.broadcast %cst_37 : f32 to vector<2x128xf32>
    %231 = arith.addf %230, %229 : vector<2x128xf32>
    %232 = arith.divf %230, %231 : vector<2x128xf32>
    %233 = vector.extract_strided_slice %221 {offsets = [0, 128], sizes = [2, 128], strides = [1, 1]} : vector<2x384xf32> to vector<2x128xf32>
    %234 = vector.extract_strided_slice %224 {offsets = [0, 128], sizes = [2, 128], strides = [1, 1]} : vector<2x384xf32> to vector<2x128xf32>
    %235 = arith.addf %233, %234 : vector<2x128xf32>
    %236 = arith.negf %235 : vector<2x128xf32>
    %237 = math.exp %236 : vector<2x128xf32>
    %cst_38 = arith.constant 1.000000e+00 : f32
    %238 = vector.broadcast %cst_38 : f32 to vector<2x128xf32>
    %239 = arith.addf %238, %237 : vector<2x128xf32>
    %240 = arith.divf %238, %239 : vector<2x128xf32>
    %241 = vector.extract_strided_slice %221 {offsets = [0, 256], sizes = [2, 128], strides = [1, 1]} : vector<2x384xf32> to vector<2x128xf32>
    %242 = vector.extract_strided_slice %224 {offsets = [0, 256], sizes = [2, 128], strides = [1, 1]} : vector<2x384xf32> to vector<2x128xf32>
    %243 = arith.mulf %232, %242 : vector<2x128xf32>
    %244 = arith.addf %241, %243 : vector<2x128xf32>
    %245 = math.tanh %244 : vector<2x128xf32>
    %cst_39 = arith.constant 1.000000e+00 : f32
    %246 = vector.broadcast %cst_39 : f32 to vector<2x128xf32>
    %247 = arith.subf %246, %240 : vector<2x128xf32>
    %248 = arith.mulf %247, %245 : vector<2x128xf32>
    %249 = arith.mulf %240, %220 : vector<2x128xf32>
    %250 = arith.addf %248, %249 : vector<2x128xf32>
    %c0_40 = arith.constant 0 : index
    %c0_41 = arith.constant 0 : index
    %251 = vector.load %arg6[%c0_40, %c0_41] : memref<128x384xf32, #tpu.memory_space<vmem>>, vector<128x384xf32>
    %252 = vector.extract_strided_slice %40 {offsets = [0, 0], sizes = [1, 128], strides = [1, 1]} : vector<2x128xf32> to vector<1x128xf32>
    %253 = vector.extract_strided_slice %70 {offsets = [0, 0], sizes = [1, 128], strides = [1, 1]} : vector<2x128xf32> to vector<1x128xf32>
    %254 = vector.extract_strided_slice %100 {offsets = [0, 0], sizes = [1, 128], strides = [1, 1]} : vector<2x128xf32> to vector<1x128xf32>
    %255 = vector.extract_strided_slice %130 {offsets = [0, 0], sizes = [1, 128], strides = [1, 1]} : vector<2x128xf32> to vector<1x128xf32>
    %256 = vector.extract_strided_slice %160 {offsets = [0, 0], sizes = [1, 128], strides = [1, 1]} : vector<2x128xf32> to vector<1x128xf32>
    %257 = vector.extract_strided_slice %190 {offsets = [0, 0], sizes = [1, 128], strides = [1, 1]} : vector<2x128xf32> to vector<1x128xf32>
    %258 = vector.extract_strided_slice %220 {offsets = [0, 0], sizes = [1, 128], strides = [1, 1]} : vector<2x128xf32> to vector<1x128xf32>
    %259 = vector.extract_strided_slice %250 {offsets = [0, 0], sizes = [1, 128], strides = [1, 1]} : vector<2x128xf32> to vector<1x128xf32>
    %260 = tpu.concatenate %252, %253, %254, %255, %256, %257, %258, %259 in 0 : vector<1x128xf32>, vector<1x128xf32>, vector<1x128xf32>, vector<1x128xf32>, vector<1x128xf32>, vector<1x128xf32>, vector<1x128xf32>, vector<1x128xf32> -> vector<8x128xf32>
    %cst_42 = arith.constant dense<0.000000e+00> : vector<8x384xf32>
    %261 = tpu.matmul %260, %251, %cst_42 {dimension_numbers = #tpu.dot_dimension_numbers<[1], [0], [0], [1], [0, 0, 1, 1], [], []>} : vector<8x128xf32>, vector<128x384xf32>, vector<8x384xf32> -> vector<8x384xf32>
    %262 = vector.broadcast %3 : vector<1x384xf32> to vector<8x384xf32>
    %263 = arith.addf %261, %262 : vector<8x384xf32>
    %264 = vector.extract_strided_slice %263 {offsets = [0, 0], sizes = [8, 128], strides = [1, 1]} : vector<8x384xf32> to vector<8x128xf32>
    %265 = vector.extract_strided_slice %263 {offsets = [0, 128], sizes = [8, 128], strides = [1, 1]} : vector<8x384xf32> to vector<8x128xf32>
    %266 = vector.extract_strided_slice %263 {offsets = [0, 256], sizes = [8, 128], strides = [1, 1]} : vector<8x384xf32> to vector<8x128xf32>
    "tpu.trace_start"() <{level = 10 : i32, message = "sd,td->st"}> : () -> ()
    %cst_43 = arith.constant dense<0.000000e+00> : vector<8x8xf32>
    %267 = tpu.matmul %264, %265, %cst_43 {dimension_numbers = #tpu.dot_dimension_numbers<[1], [1], [0], [0], [0, 0, 1, 0], [], []>} : vector<8x128xf32>, vector<8x128xf32>, vector<8x8xf32> -> vector<8x8xf32>
    "tpu.trace_stop"() : () -> ()
    %cst_44 = arith.constant 0.158113882 : f32
    %268 = vector.broadcast %cst_44 : f32 to vector<8x8xf32>
    %269 = arith.mulf %267, %268 : vector<8x8xf32>
    %cst_45 = arith.constant dense<0xFF800000> : vector<8xf32>
    %270 = vector.multi_reduction <maximumf>, %269, %cst_45 [1] : vector<8x8xf32> to vector<8xf32>
    %271 = vector.shape_cast %270 : vector<8xf32> to vector<8x1xf32>
    %272 = vector.broadcast %271 : vector<8x1xf32> to vector<8x8xf32>
    %273 = arith.subf %269, %272 : vector<8x8xf32>
    %274 = math.exp %273 : vector<8x8xf32>
    %cst_46 = arith.constant dense<0.000000e+00> : vector<8xf32>
    %275 = vector.multi_reduction <add>, %274, %cst_46 [1] : vector<8x8xf32> to vector<8xf32>
    %276 = vector.shape_cast %275 : vector<8xf32> to vector<8x1xf32>
    %277 = tpu.reciprocal %276 {approx = true} : vector<8x1xf32> -> vector<8x1xf32>
    %278 = vector.broadcast %277 : vector<8x1xf32> to vector<8x8xf32>
    %279 = arith.mulf %274, %278 : vector<8x8xf32>
    %cst_47 = arith.constant dense<0.000000e+00> : vector<8x128xf32>
    %280 = tpu.matmul %279, %266, %cst_47 {dimension_numbers = #tpu.dot_dimension_numbers<[1], [0], [0], [1], [0, 0, 1, 1], [], []>} : vector<8x8xf32>, vector<8x128xf32>, vector<8x128xf32> -> vector<8x128xf32>
    %cst_48 = arith.constant dense<0.000000e+00> : vector<128xf32>
    %281 = vector.multi_reduction <add>, %280, %cst_48 [0] : vector<8x128xf32> to vector<128xf32>
    %282 = vector.shape_cast %281 : vector<128xf32> to vector<1x128xf32>
    %283 = vector.extract_strided_slice %40 {offsets = [1, 0], sizes = [1, 128], strides = [1, 1]} : vector<2x128xf32> to vector<1x128xf32>
    %284 = vector.extract_strided_slice %70 {offsets = [1, 0], sizes = [1, 128], strides = [1, 1]} : vector<2x128xf32> to vector<1x128xf32>
    %285 = vector.extract_strided_slice %100 {offsets = [1, 0], sizes = [1, 128], strides = [1, 1]} : vector<2x128xf32> to vector<1x128xf32>
    %286 = vector.extract_strided_slice %130 {offsets = [1, 0], sizes = [1, 128], strides = [1, 1]} : vector<2x128xf32> to vector<1x128xf32>
    %287 = vector.extract_strided_slice %160 {offsets = [1, 0], sizes = [1, 128], strides = [1, 1]} : vector<2x128xf32> to vector<1x128xf32>
    %288 = vector.extract_strided_slice %190 {offsets = [1, 0], sizes = [1, 128], strides = [1, 1]} : vector<2x128xf32> to vector<1x128xf32>
    %289 = vector.extract_strided_slice %220 {offsets = [1, 0], sizes = [1, 128], strides = [1, 1]} : vector<2x128xf32> to vector<1x128xf32>
    %290 = vector.extract_strided_slice %250 {offsets = [1, 0], sizes = [1, 128], strides = [1, 1]} : vector<2x128xf32> to vector<1x128xf32>
    %291 = tpu.concatenate %283, %284, %285, %286, %287, %288, %289, %290 in 0 : vector<1x128xf32>, vector<1x128xf32>, vector<1x128xf32>, vector<1x128xf32>, vector<1x128xf32>, vector<1x128xf32>, vector<1x128xf32>, vector<1x128xf32> -> vector<8x128xf32>
    %cst_49 = arith.constant dense<0.000000e+00> : vector<8x384xf32>
    %292 = tpu.matmul %291, %251, %cst_49 {dimension_numbers = #tpu.dot_dimension_numbers<[1], [0], [0], [1], [0, 0, 1, 1], [], []>} : vector<8x128xf32>, vector<128x384xf32>, vector<8x384xf32> -> vector<8x384xf32>
    %293 = vector.broadcast %3 : vector<1x384xf32> to vector<8x384xf32>
    %294 = arith.addf %292, %293 : vector<8x384xf32>
    %295 = vector.extract_strided_slice %294 {offsets = [0, 0], sizes = [8, 128], strides = [1, 1]} : vector<8x384xf32> to vector<8x128xf32>
    %296 = vector.extract_strided_slice %294 {offsets = [0, 128], sizes = [8, 128], strides = [1, 1]} : vector<8x384xf32> to vector<8x128xf32>
    %297 = vector.extract_strided_slice %294 {offsets = [0, 256], sizes = [8, 128], strides = [1, 1]} : vector<8x384xf32> to vector<8x128xf32>
    "tpu.trace_start"() <{level = 10 : i32, message = "sd,td->st"}> : () -> ()
    %cst_50 = arith.constant dense<0.000000e+00> : vector<8x8xf32>
    %298 = tpu.matmul %295, %296, %cst_50 {dimension_numbers = #tpu.dot_dimension_numbers<[1], [1], [0], [0], [0, 0, 1, 0], [], []>} : vector<8x128xf32>, vector<8x128xf32>, vector<8x8xf32> -> vector<8x8xf32>
    "tpu.trace_stop"() : () -> ()
    %cst_51 = arith.constant 0.158113882 : f32
    %299 = vector.broadcast %cst_51 : f32 to vector<8x8xf32>
    %300 = arith.mulf %298, %299 : vector<8x8xf32>
    %cst_52 = arith.constant dense<0xFF800000> : vector<8xf32>
    %301 = vector.multi_reduction <maximumf>, %300, %cst_52 [1] : vector<8x8xf32> to vector<8xf32>
    %302 = vector.shape_cast %301 : vector<8xf32> to vector<8x1xf32>
    %303 = vector.broadcast %302 : vector<8x1xf32> to vector<8x8xf32>
    %304 = arith.subf %300, %303 : vector<8x8xf32>
    %305 = math.exp %304 : vector<8x8xf32>
    %cst_53 = arith.constant dense<0.000000e+00> : vector<8xf32>
    %306 = vector.multi_reduction <add>, %305, %cst_53 [1] : vector<8x8xf32> to vector<8xf32>
    %307 = vector.shape_cast %306 : vector<8xf32> to vector<8x1xf32>
    %308 = tpu.reciprocal %307 {approx = true} : vector<8x1xf32> -> vector<8x1xf32>
    %309 = vector.broadcast %308 : vector<8x1xf32> to vector<8x8xf32>
    %310 = arith.mulf %305, %309 : vector<8x8xf32>
    %cst_54 = arith.constant dense<0.000000e+00> : vector<8x128xf32>
    %311 = tpu.matmul %310, %297, %cst_54 {dimension_numbers = #tpu.dot_dimension_numbers<[1], [0], [0], [1], [0, 0, 1, 1], [], []>} : vector<8x8xf32>, vector<8x128xf32>, vector<8x128xf32> -> vector<8x128xf32>
    %cst_55 = arith.constant dense<0.000000e+00> : vector<128xf32>
    %312 = vector.multi_reduction <add>, %311, %cst_55 [0] : vector<8x128xf32> to vector<128xf32>
    %313 = vector.shape_cast %312 : vector<128xf32> to vector<1x128xf32>
    %314 = tpu.concatenate %282, %313 in 0 : vector<1x128xf32>, vector<1x128xf32> -> vector<2x128xf32>
    %c0_56 = arith.constant 0 : index
    %c0_57 = arith.constant 0 : index
    %315 = vector.load %arg8[%c0_56, %c0_57] : memref<128x50xf32, #tpu.memory_space<vmem>>, vector<128x50xf32>
    %cst_58 = arith.constant dense<0.000000e+00> : vector<2x50xf32>
    %316 = tpu.matmul %314, %315, %cst_58 {dimension_numbers = #tpu.dot_dimension_numbers<[1], [0], [0], [1], [0, 0, 1, 1], [], []>} : vector<2x128xf32>, vector<128x50xf32>, vector<2x50xf32> -> vector<2x50xf32>
    %c0_59 = arith.constant 0 : index
    %c0_60 = arith.constant 0 : index
    %317 = vector.load %arg2[%c0_59, %c0_60] : memref<2x3xf32, #tpu.memory_space<vmem>>, vector<2x3xf32>
    %c0_61 = arith.constant 0 : index
    %c0_62 = arith.constant 0 : index
    %318 = vector.load %arg9[%c0_61, %c0_62] : memref<3x50xf32, #tpu.memory_space<vmem>>, vector<3x50xf32>
    %cst_63 = arith.constant dense<0.000000e+00> : vector<2x50xf32>
    %319 = tpu.matmul %317, %318, %cst_63 {dimension_numbers = #tpu.dot_dimension_numbers<[1], [0], [0], [1], [0, 0, 1, 1], [], []>} : vector<2x3xf32>, vector<3x50xf32>, vector<2x50xf32> -> vector<2x50xf32>
    %320 = arith.addf %316, %319 : vector<2x50xf32>
    %c0_64 = arith.constant 0 : index
    %c0_65 = arith.constant 0 : index
    %321 = vector.load %arg11[%c0_64, %c0_65] : memref<1x50xf32, #tpu.memory_space<vmem>>, vector<1x50xf32>
    %322 = vector.broadcast %321 : vector<1x50xf32> to vector<2x50xf32>
    %323 = arith.addf %320, %322 : vector<2x50xf32>
    %c0_66 = arith.constant 0 : index
    %c0_67 = arith.constant 0 : index
    %324 = vector.load %arg3[%c0_66, %c0_67] : memref<2x1xf32, #tpu.memory_space<vmem>>, vector<2x1xf32>
    %c0_68 = arith.constant 0 : index
    %c0_69 = arith.constant 0 : index
    %325 = vector.load %arg10[%c0_68, %c0_69] : memref<1x50xf32, #tpu.memory_space<vmem>>, vector<1x50xf32>
    %326 = vector.broadcast %324 : vector<2x1xf32> to vector<2x50xf32>
    %327 = vector.broadcast %325 : vector<1x50xf32> to vector<2x50xf32>
    %328 = arith.mulf %326, %327 : vector<2x50xf32>
    %329 = arith.addf %323, %328 : vector<2x50xf32>
    %330 = math.tanh %329 : vector<2x50xf32>
    %c0_70 = arith.constant 0 : index
    %c0_71 = arith.constant 0 : index
    %331 = vector.load %arg12[%c0_70, %c0_71] : memref<2x50xf32, #tpu.memory_space<vmem>>, vector<2x50xf32>
    tpu.vector_store %arg12[%c0_70, %c0_71], %330 {strides = array<i32>} : memref<2x50xf32, #tpu.memory_space<vmem>>, vector<2x50xf32>,
    return
  }
  func.func @transform_0(%arg0: i32) -> (i32, i32) {
    %c0_i32 = arith.constant 0 : i32
    %c0_i32_0 = arith.constant 0 : i32
    %c0_i32_1 = arith.constant 0 : i32
    return %c0_i32, %c0_i32_0 : i32, i32
  }
  func.func @transform_1(%arg0: i32) -> (i32, i32) {
    %c0_i32 = arith.constant 0 : i32
    %c0_i32_0 = arith.constant 0 : i32
    %c0_i32_1 = arith.constant 0 : i32
    return %c0_i32, %c0_i32_0 : i32, i32
  }
  func.func @transform_2(%arg0: i32) -> (i32, i32) {
    %c0_i32 = arith.constant 0 : i32
    %c0_i32_0 = arith.constant 0 : i32
    %c0_i32_1 = arith.constant 0 : i32
    return %c0_i32, %c0_i32_0 : i32, i32
  }
  func.func @transform_3(%arg0: i32) -> (i32, i32) {
    %c0_i32 = arith.constant 0 : i32
    %c0_i32_0 = arith.constant 0 : i32
    %c0_i32_1 = arith.constant 0 : i32
    return %c0_i32, %c0_i32_0 : i32, i32
  }
  func.func @transform_4(%arg0: i32) -> (i32, i32) {
    %c0_i32 = arith.constant 0 : i32
    %c0_i32_0 = arith.constant 0 : i32
    %c0_i32_1 = arith.constant 0 : i32
    return %c0_i32, %c0_i32_0 : i32, i32
  }
  func.func @transform_5(%arg0: i32) -> (i32, i32) {
    %c0_i32 = arith.constant 0 : i32
    %c0_i32_0 = arith.constant 0 : i32
    %c0_i32_1 = arith.constant 0 : i32
    return %c0_i32, %c0_i32_0 : i32, i32
  }
  func.func @transform_6(%arg0: i32) -> (i32, i32) {
    %c0_i32 = arith.constant 0 : i32
    %c0_i32_0 = arith.constant 0 : i32
    %c0_i32_1 = arith.constant 0 : i32
    return %c0_i32, %c0_i32_0 : i32, i32
  }
  func.func @transform_7(%arg0: i32) -> (i32, i32) {
    %c0_i32 = arith.constant 0 : i32
    %c0_i32_0 = arith.constant 0 : i32
    %c0_i32_1 = arith.constant 0 : i32
    return %c0_i32, %c0_i32_0 : i32, i32
  }
  func.func @transform_8(%arg0: i32) -> (i32, i32) {
    %c0_i32 = arith.constant 0 : i32
    %c0_i32_0 = arith.constant 0 : i32
    %c0_i32_1 = arith.constant 0 : i32
    return %c0_i32, %c0_i32_0 : i32, i32
  }
  func.func @transform_9(%arg0: i32) -> (i32, i32) {
    %c0_i32 = arith.constant 0 : i32
    %c0_i32_0 = arith.constant 0 : i32
    %c0_i32_1 = arith.constant 0 : i32
    return %c0_i32, %c0_i32_0 : i32, i32
  }
  func.func @transform_10(%arg0: i32) -> (i32, i32) {
    %c0_i32 = arith.constant 0 : i32
    %c0_i32_0 = arith.constant 0 : i32
    %c0_i32_1 = arith.constant 0 : i32
    return %c0_i32, %c0_i32_0 : i32, i32
  }
  func.func @transform_11(%arg0: i32) -> (i32, i32) {
    %c0_i32 = arith.constant 0 : i32
    %c0_i32_0 = arith.constant 0 : i32
    %c0_i32_1 = arith.constant 0 : i32
    return %c0_i32, %c0_i32_0 : i32, i32
  }
}

</mosaic_0001>

<bundles_post_ra>
// kernel: forward.1
= control target key start
LH: loop header
LB: loop body
LE: loop exit
PB: predicated region body
PF: predicated region fallthrough
CT: control target
= control target key end

     0   :  { %16 = vsyncpa [#allocation3], 0  ;;  %s4905_s0 = inlined_call_operand.vmem [shape: f32[16,5], index: 0, kind: input, shape index: {}]   ;;  %s4906_s1 = inlined_call_operand.vmem [shape: f32[2,3], index: 1, kind: input, shape index: {}]   ;;  %s4907_s2 = inlined_call_operand.vmem [shape: f32[2,1], index: 2, kind: input, shape index: {}]   ;;  %s4908_s3 = inlined_call_operand.vmem [shape: f32[5,384], index: 3, kind: input, shape index: {}]   ;;  %s4909_s4 = inlined_call_operand.hbm [shape: f32[128,384], index: 4, kind: input, shape index: {}]   ;;  %s4910_s5 = inlined_call_operand.hbm [shape: f32[128,384], index: 5, kind: input, shape index: {}]   ;;  %s4911_s6 = inlined_call_operand.vmem [shape: f32[3,384], index: 6, kind: input, shape index: {}]   ;;  %s4912_s7 = inlined_call_operand.vmem [shape: f32[128,50], index: 7, kind: input, shape index: {}]   ;;  %s4913_s8 = inlined_call_operand.vmem [shape: f32[3,50], index: 8, kind: input, shape index: {}]   ;;  %s4914_s9 = inlined_call_operand.vmem [shape: f32[1,50], index: 9, kind: input, shape index: {}]   ;;  %s4915_s10 = inlined_call_operand.vmem [shape: f32[1,50], index: 10, kind: input, shape index: {}]   ;;  %s4916_s11 = inlined_call_operand.hbm [shape: f32[2,50], index: 11, kind: output, shape index: {}]  }
   0x1   :  { %17 = vsyncpa [#allocation6], 0 }
   0x2   :  { %18 = vsyncpa [#allocation4], 0  ;;  %s4059_s17 = smov [#allocation2]   ;;  %s3987_s21 = scalar_lea.hbm %s4909_s4, 6144 }
   0x3   :  { %s32_s18 = sshll.u32 %s4059_s17, 4  ;;  %p3988_p0 = scmp.ne.s32.totalorder %s4909_s4, %s3987_s21  ;;  %s33_s18 = int_to_ptr.vmem [resolvable:$true] %s32_s18 }
   0x4   :  { %p3991_p1 = scmp.lt.u32.totalorder %s3987_s21, %s4909_s4 }
   0x6   :  { %p3993_p2 = pnand %p3991_p1, %p3988_p0 }
   0x8   :  { %3996 = shalt.err (!%p3993_p2)
}
   0x9   :  { %s3997_s26 = scalar_lea.vmem %s33_s18, 6144  ;;  %p4002_p4 = scmp.lt.s32.totalorder %s33_s18, %s33_s18 }
   0xa   :  { %p3998_p3 = scmp.ne.s32.totalorder %s33_s18, %s3997_s26  ;;  %p4003_p5 = scmp.lt.s32.totalorder %s3997_s26, %s3997_s26 }
   0xc   :  { %p4004_p6 = por %p4003_p5, %p4002_p4 }
   0xe   :  { %p4005_p7 = pnand %p4004_p6, %p3998_p3 }
  0x10   :  { %4008 = shalt.err (!%p4005_p7)
}
  0x11   :  { %s4060_s27 = smov 384   ;;  %s4061_s28 = smov 24  }
  0x12   :  { %38 = dma.hbm_to_vmem [thread:$0]  %s4909_s4, 6144, %s33_s18, [#allocation3], %s4060_s27, %s4060_s27, %s4061_s28  }
  0x13   :  { %s4062_s12 = smov [#allocation5]   ;;  %s4009_s16 = scalar_lea.hbm %s4910_s5, 6144 }
  0x14   :  { %s44_s13 = sshll.u32 %s4062_s12, 4  ;;  %p4010_p8 = scmp.ne.s32.totalorder %s4910_s5, %s4009_s16  ;;  %s45_s13 = int_to_ptr.vmem [resolvable:$true] %s44_s13 }
  0x15   :  { %p4013_p9 = scmp.lt.u32.totalorder %s4009_s16, %s4910_s5 }
  0x17   :  { %p4015_p10 = pnand %p4013_p9, %p4010_p8 }
  0x19   :  { %4018 = shalt.err (!%p4015_p10)
}
  0x1a   :  { %s4019_s22 = scalar_lea.vmem %s45_s13, 6144  ;;  %p4024_p12 = scmp.lt.s32.totalorder %s45_s13, %s45_s13 }
  0x1b   :  { %p4020_p11 = scmp.ne.s32.totalorder %s45_s13, %s4019_s22  ;;  %p4025_p13 = scmp.lt.s32.totalorder %s4019_s22, %s4019_s22 }
  0x1d   :  { %p4026_p0 = por %p4025_p13, %p4024_p12 }
  0x1f   :  { %p4027_p1 = pnand %p4026_p0, %p4020_p11 }
  0x21   :  { %4030 = shalt.err (!%p4027_p1)
}
  0x22   :  { %50 = dma.hbm_to_vmem [thread:$0]  %s4910_s5, 6144, %s45_s13, [#allocation6], %s4060_s27, %s4060_s27, %s4061_s28  }
  0x23   :  { %4053 = dma.done.wait [#allocation3], 6144  }
  0x24   :  { %4054 = vsyncadd [#allocation3], 4294961152 }
  0x25   :  { %4055 = dma.done.wait [#allocation6], 6144  }
  0x26   :  { %4056 = vsyncadd [#allocation6], 4294961152  ;;  %v4063_v0 = vmov 0.0   ;;  %v4064_v1 = vmov 0.0|0.0   ;;  %vm4065_vm0 = vmmov 0   ;;  %vm110_vm1 = vcmask 1044480  }
  0x27   :  { %184 = vmatprep.mubr.f32.mxu0 %v4063_v0  ;;  %3333 = vmatprep.subr.bf16.mxu1 %v4064_v1  ;;  %v72_v2 = vld [vmem:[%s4908_s3 + $0x8] sm:$0x1f]  ;;  %v71_v3 = vld [vmem:[%s4908_s3] sm:$0x1f]  ;;  %vm103_vm2 = vcmask 39936   ;;  %v275_v11 = vld [vmem:[#allocation2 + $0x18] sm:$0xff] }
  0x28   :  { %2923 = vmatprep.mubr.msk.f32.mxu1 %vm4065_vm0, %v4063_v0  ;;  %v69_v4 = vld [vmem:[%s4905_s0] sm:$0xff]  ;;  %2657 = vmatprep.subr.msk.mxu0 %vm110_vm1, %v72_v2  ;;  %v73_v5 = vld [vmem:[%s4908_s3 + $0x10] sm:$0x1f]  ;;  %v273_v6 = vld [vmem:[#allocation2 + $0x8] sm:$0xff]  ;;  %vm1787_vm3 = vcmask 1040384   ;;  %vm1789_vm4 = vcmask 1041408  }
  0x29   :  { %2658 = vmatpush1.msk.msra.mxu0 %vm110_vm1, %v71_v3  ;;  %v276_v7 = vld [vmem:[#allocation2 + $0x20] sm:$0xff]  ;;  %v70_v9 = vld [vmem:[%s4905_s0 + $0x8] sm:$0xff]  ;;  %v279_v12 = vld [vmem:[#allocation2 + $0x38] sm:$0xff]  ;;  %vm1791_vm5 = vcmask 1042432   ;;  %vm1793_vm6 = vcmask 1043456   ;;  %vm1796_vm7 = vcmask 1045504  }
  0x2a   :  { %2659 = vmatmul.mubr.msk.f32.vlgmr.msra.gmra.mrb[0].mxu0 %vm103_vm2, %v69_v4  ;;  %2886 = vmatprep.subr.msk.mxu0 %vm110_vm1, %v73_v5  ;;  %v4172_v8 = vpack.c.bf16 %v276_v7, %v273_v6  ;;  %v272_v10 = vld [vmem:[#allocation2] sm:$0xff]  ;;  %v282_v13 = vld [vmem:[#allocation2 + $0x50] sm:$0xff]  ;;  %v281_v17 = vld [vmem:[#allocation2 + $0x48] sm:$0xff]  ;;  %vm1798_vm8 = vcmask 1046528   ;;  %vm2039_vm9 = vcmask 64512   ;;  %vm2468_vm10 = vcmask 23552  }
  0x2b   :  { %2887 = vmatpush3.msk.msra.mxu0 %vm110_vm1, %v73_v5  ;;  %190 = vmatprep.mubr.f32.mxu0 %v4063_v0  ;;  %v4182_v14 = vpack.c.bf16 %v275_v11, %v272_v10  ;;  %v4184_v15 = vpack.c.bf16 %v282_v13, %v279_v12  ;;  %v278_v16 = vld [vmem:[#allocation2 + $0x30] sm:$0xff]  ;;  %v285_v18 = vld [vmem:[#allocation2 + $0x68] sm:$0xff]  ;;  %v288_v19 = vld [vmem:[#allocation2 + $0x80] sm:$0xff]  ;;  %s4067_s30 = smov [#allocation7]   ;;  %vm2639_vm11 = vcmask 402432  }
  0x2c   :  { %3302 = vmatprep.subr.bf16.mxu0 %v4172_v8  ;;  %v274_v20 = vld [vmem:[#allocation2 + $0x10] sm:$0xff]  ;;  %v4188_v21 = vpack.c.bf16 %v281_v17, %v278_v16  ;;  %v284_v22 = vld [vmem:[#allocation2 + $0x60] sm:$0xff]  ;;  %v277_v23 = vld [vmem:[#allocation2 + $0x28] sm:$0xff]  ;;  %v4192_v24 = vpack.c.bf16 %v288_v19, %v285_v18  ;;  %s2647_s12 = sshll.u32 %s4067_s30, 4  ;;  %s2648_s12 = int_to_ptr.vmem [resolvable:$true] %s2647_s12 }
  0x2d   :  { %v287_v25 = vld [vmem:[#allocation2 + $0x78] sm:$0xff]  ;;  %v4194_v26 = vpack.c.bf16 %v277_v23, %v274_v20  ;;  %v280_v27 = vld [vmem:[#allocation2 + $0x40] sm:$0xff]  ;;  %v294_v30 = vld [vmem:[#allocation2 + $0xb0] sm:$0xff]  ;;  %v76_v20 = vlaneseq  ;;  %s4031_s0 = scalar_lea.vmem %s2648_s12, 32  ;;  %p4036_p3 = scmp.lt.s32.totalorder %s2648_s12, %s2648_s12 }
  0x2e   :  { %2660 = vmatmul.mubr.msk.f32.gmra.mrb[2].mxu0 %vm103_vm2, %v70_v9  ;;  %v283_v28 = vld [vmem:[#allocation2 + $0x58] sm:$0xff]  ;;  %v4200_v32 = vpack.c.bf16 %v287_v25, %v284_v22  ;;  %v286_v33 = vld [vmem:[#allocation2 + $0x70] sm:$0xff]  ;;  %v289_v34 = vld [vmem:[#allocation2 + $0x88] sm:$0xff]  ;;  %p4032_p2 = scmp.ne.s32.totalorder %s2648_s12, %s4031_s0  ;;  %p4037_p4 = scmp.lt.s32.totalorder %s4031_s0, %s4031_s0 }
  0x2f   :  { %2888 = vmatprep.mubr.msk.f32.mxu0 %vm103_vm2, %v69_v4  ;;  %v291_v29 = vld [vmem:[#allocation2 + $0x98] sm:$0xff]  ;;  %3335 = vmatpush3.bf16.msra.mxu1 %v4194_v26  ;;  %v4197_v31 = vpack.c.bf16 %v283_v28, %v280_v27  ;;  %v290_v36 = vld [vmem:[#allocation2 + $0x90] sm:$0xff]  ;;  %v293_v37 = vld [vmem:[#allocation2 + $0xa8] sm:$0xff]  ;;  %v4207_v40 = vpack.c.bf16 %v289_v34, %v286_v33  ;;  %v4299_v22 = vshrl.u32 %v76_v20, 7 }
  0x30   :  { %3336 = vmatprep.subr.bf16.mxu1 %v4064_v1  ;;  %v4204_v35 = vpack.c.bf16 %v294_v30, %v291_v29  ;;  %v297_v38 = vld [vmem:[#allocation2 + $0xc8] sm:$0xff]  ;;  %v300_v39 = vld [vmem:[#allocation2 + $0xe0] sm:$0xff]  ;;  %v4210_v41 = vpack.c.bf16 %v293_v37, %v290_v36  ;;  %v295_v43 = vld [vmem:[#allocation2 + $0xb8] sm:$0xff]  ;;  %p4038_p5 = por %p4037_p4, %p4036_p3 }
  0x31   :  { %v292_v42 = vld [vmem:[#allocation2 + $0xa0] sm:$0xff]  ;;  %v4214_v44 = vpack.c.bf16 %v300_v39, %v297_v38  ;;  %v299_v46 = vld [vmem:[#allocation2 + $0xd8] sm:$0xff]  ;;  %v306_v48 = vld [vmem:[#allocation2 + $0x110] sm:$0xff]  ;;  %v78_v23 = vsub.s32 0, %v4299_v22  ;;  %v82_v27 = vsub.s32 4, %v4299_v22 }
  0x32   :  { %2889 = vmatmul.mubr.msk.f32.vlgmr.msra.gmra.mrb[4].mxu0 %vm103_vm2, %v70_v9  ;;  %v296_v45 = vld [vmem:[#allocation2 + $0xc0] sm:$0xff]  ;;  %v303_v47 = vld [vmem:[#allocation2 + $0xf8] sm:$0xff]  ;;  %v4217_v49 = vpack.c.bf16 %v295_v43, %v292_v42  ;;  %v298_v51 = vld [vmem:[#allocation2 + $0xd0] sm:$0xff]  ;;  %p4039_p6 = pnand %p4038_p5, %p4032_p2 }
  0x33   :  { %3304 = vmatpush1.bf16.msra.mxu0 %v4182_v14  ;;  %411 = vmatprep.mubr.f32.mxu0 %v4063_v0  ;;  %v4220_v50 = vpack.c.bf16 %v299_v46, %v296_v45  ;;  %v301_v52 = vld [vmem:[#allocation2 + $0xe8] sm:$0xff]  ;;  %v4224_v53 = vpack.c.bf16 %v306_v48, %v303_v47  ;;  %v302_v54 = vld [vmem:[#allocation2 + $0xf0] sm:$0xff]  ;;  %v312_v57 = vld [vmem:[#allocation2 + $0x140] sm:$0xff] }
  0x34   :  { %3306 = vmatprep.subr.bf16.mxu0 %v4184_v15  ;;  %3338 = vmatpush3.bf16.msra.mxu1 %v4197_v31  ;;  %v305_v55 = vld [vmem:[#allocation2 + $0x108] sm:$0xff]  ;;  %v4227_v58 = vpack.c.bf16 %v301_v52, %v298_v51  ;;  %v304_v60 = vld [vmem:[#allocation2 + $0x100] sm:$0xff]  ;;  %v307_v61 = vld [vmem:[#allocation2 + $0x118] sm:$0xff]  ;;  %v322_v52 = vsub.s32 1, %v4299_v22 }
  0x35   :  { %3339 = vmatprep.subr.bf16.mxu1 %v4064_v1  ;;  %v309_v56 = vld [vmem:[#allocation2 + $0x128] sm:$0xff]  ;;  %v4230_v59 = vpack.c.bf16 %v305_v55, %v302_v54  ;;  %v308_v63 = vld [vmem:[#allocation2 + $0x120] sm:$0xff]  ;;  %v311_v2 = vld [vmem:[#allocation2 + $0x138] sm:$0xff]  ;;  %v4237_v5 = vpack.c.bf16 %v307_v61, %v304_v60  ;;  %v326_v54 = vsub.s32 5, %v4299_v22 }
  0x36   :  { %v4234_v62 = vpack.c.bf16 %v312_v57, %v309_v56  ;;  %v315_v3 = vld [vmem:[#allocation2 + $0x158] sm:$0xff]  ;;  %v318_v4 = vld [vmem:[#allocation2 + $0x170] sm:$0xff]  ;;  %v4240_v6 = vpack.c.bf16 %v311_v2, %v308_v63  ;;  %v313_v9 = vld [vmem:[#allocation2 + $0x148] sm:$0xff] }
  0x37   :  { %3308 = vmatpush1.bf16.msra.mxu0 %v4188_v21  ;;  %v310_v7 = vld [vmem:[#allocation2 + $0x130] sm:$0xff]  ;;  %v4244_v10 = vpack.c.bf16 %v318_v4, %v315_v3  ;;  %v317_v12 = vld [vmem:[#allocation2 + $0x168] sm:$0xff]  ;;  %v316_v17 = vld [vmem:[#allocation2 + $0x160] sm:$0xff] }
  0x38   :  { %3310 = vmatprep.subr.bf16.mxu0 %v4192_v24  ;;  %3341 = vmatpush3.bf16.msra.mxu1 %v4207_v40  ;;  %v314_v11 = vld [vmem:[#allocation2 + $0x150] sm:$0xff]  ;;  %v4247_v13 = vpack.c.bf16 %v313_v9, %v310_v7  ;;  %v319_v18 = vld [vmem:[#allocation2 + $0x178] sm:$0xff]  ;;  %v67_v25 = vld [vmem:[%s4911_s6] sm:$0x77] }
  0x39   :  { %3342 = vmatprep.subr.bf16.mxu1 %v4064_v1  ;;  %v4250_v16 = vpack.c.bf16 %v317_v12, %v314_v11  ;;  %v4255_v19 = vpack.c.bf16 %v319_v18, %v316_v17  ;;  %v68_v28 = vld [vmem:[%s4911_s6 + $0x8] sm:$0x7]  ;;  %v79_v29 = vrot.slane %v67_v25, %v78_v23  ;;  %v83_v33 = vrot.slane %v67_v25, %v82_v27 }
  0x3a   :  { %v87_v36 = vrot.slane %v68_v28, %v78_v23  ;;  %v323_v55 = vrot.slane %v67_v25, %v322_v52  ;;  %v327_v56 = vrot.slane %v67_v25, %v326_v54  ;;  %v331_v27 = vrot.slane %v68_v28, %v322_v52 }
  0x3b   :  { %3312 = vmatpush1.bf16.msra.mxu0 %v4200_v32  ;;  %v94_v37 = vrot.slane %v79_v29, %v78_v23  ;;  %v98_v38 = vrot.slane %v83_v33, %v78_v23 }
  0x3c   :  { %3314 = vmatprep.subr.bf16.mxu0 %v4204_v35  ;;  %3344 = vmatpush3.bf16.msra.mxu1 %v4217_v49  ;;  %v102_v45 = vrot.slane %v87_v36, %v78_v23  ;;  %v4317_v57 = vrot.slane %v323_v55, %v322_v52  ;;  %v4319_v60 = vrot.slane %v327_v56, %v322_v52 }
  0x3d   :  { %3345 = vmatprep.subr.bf16.mxu1 %v4064_v1  ;;  %v4329_v29 = vrot.slane %v331_v27, %v322_v52 }
  0x3f   :  { %3316 = vmatpush1.bf16.msra.mxu0 %v4210_v41 }
  0x40   :  { %3318 = vmatprep.subr.bf16.mxu0 %v4214_v44  ;;  %3347 = vmatpush3.bf16.msra.mxu1 %v4227_v58 }
  0x41   :  { %3348 = vmatprep.subr.bf16.mxu1 %v4064_v1 }
  0x43   :  { %3320 = vmatpush1.bf16.msra.mxu0 %v4220_v50 }
  0x44   :  { %3322 = vmatprep.subr.bf16.mxu0 %v4224_v53  ;;  %3350 = vmatpush3.bf16.msra.mxu1 %v4237_v5 }
  0x45   :  { %3351 = vmatprep.subr.bf16.mxu1 %v4064_v1 }
  0x47   :  { %3324 = vmatpush1.bf16.msra.mxu0 %v4230_v59 }
  0x48   :  { %3326 = vmatprep.subr.bf16.mxu0 %v4234_v62  ;;  %3353 = vmatpush3.bf16.msra.mxu1 %v4247_v13 }
  0x49   :  { %3354 = vmatprep.subr.bf16.mxu1 %v4064_v1 }
  0x4b   :  { %3328 = vmatpush1.bf16.msra.mxu0 %v4240_v6 }
  0x4c   :  { %3330 = vmatprep.subr.bf16.mxu0 %v4244_v10  ;;  %3356 = vmatpush3.bf16.msra.mxu1 %v4255_v19 }
  0x4d   :  { %3389 = vmatprep.subr.bf16.mxu1 %v4064_v1 }
  0x4f   :  { %3332 = vmatpush1.bf16.msra.mxu0 %v4250_v16  ;;  %2924 = vmatmul.mubr.f32.vlgmr.msra.gmra.mrb[0].mxu1 %v4063_v0 }
  0x50   :  { %3358 = vmatprep.subr.bf16.mxu0 %v4172_v8  ;;  %3391 = vmatpush3.bf16.msra.mxu1 %v4194_v26 }
  0x51   :  { %2958 = vmatprep.mubr.msk.f32.mxu1 %vm4065_vm0, %v4063_v0  ;;  %3392 = vmatprep.subr.bf16.mxu1 %v4064_v1 }
  0x52   :  { %412 = vmatmul.mubr.f32.vlgmr.msra.gmra.mrb[6].mxu0 %v4063_v0 }
  0x53   :  { %3360 = vmatpush1.bf16.msra.mxu0 %v4182_v14  ;;  %573 = vmatprep.mubr.f32.mxu0 %v4063_v0 }
  0x54   :  { %3362 = vmatprep.subr.bf16.mxu0 %v4184_v15  ;;  %3394 = vmatpush3.bf16.msra.mxu1 %v4197_v31 }
  0x55   :  { %3395 = vmatprep.subr.bf16.mxu1 %v4064_v1 }
  0x57   :  { %3364 = vmatpush1.bf16.msra.mxu0 %v4188_v21 }
  0x58   :  { %3366 = vmatprep.subr.bf16.mxu0 %v4192_v24  ;;  %3397 = vmatpush3.bf16.msra.mxu1 %v4207_v40 }
  0x59   :  { %3398 = vmatprep.subr.bf16.mxu1 %v4064_v1 }
  0x5b   :  { %3368 = vmatpush1.bf16.msra.mxu0 %v4200_v32 }
  0x5c   :  { %3370 = vmatprep.subr.bf16.mxu0 %v4204_v35  ;;  %3400 = vmatpush3.bf16.msra.mxu1 %v4217_v49 }
  0x5d   :  { %3401 = vmatprep.subr.bf16.mxu1 %v4064_v1 }
  0x5f   :  { %3372 = vmatpush1.bf16.msra.mxu0 %v4210_v41 }
  0x60   :  { %3374 = vmatprep.subr.bf16.mxu0 %v4214_v44  ;;  %3403 = vmatpush3.bf16.msra.mxu1 %v4227_v58 }
  0x61   :  { %3404 = vmatprep.subr.bf16.mxu1 %v4064_v1 }
  0x63   :  { %3376 = vmatpush1.bf16.msra.mxu0 %v4220_v50 }
  0x64   :  { %3378 = vmatprep.subr.bf16.mxu0 %v4224_v53  ;;  %3406 = vmatpush3.bf16.msra.mxu1 %v4237_v5 }
  0x65   :  { %3407 = vmatprep.subr.bf16.mxu1 %v4064_v1 }
  0x67   :  { %3380 = vmatpush1.bf16.msra.mxu0 %v4230_v59 }
  0x68   :  { %3382 = vmatprep.subr.bf16.mxu0 %v4234_v62  ;;  %3409 = vmatpush3.bf16.msra.mxu1 %v4247_v13 }
  0x69   :  { %3410 = vmatprep.subr.bf16.mxu1 %v4064_v1 }
  0x6b   :  { %3384 = vmatpush1.bf16.msra.mxu0 %v4240_v6 }
  0x6c   :  { %3386 = vmatprep.subr.bf16.mxu0 %v4244_v10  ;;  %3412 = vmatpush3.bf16.msra.mxu1 %v4255_v19 }
  0x6d   :  { %3445 = vmatprep.subr.bf16.mxu1 %v4064_v1 }
  0x6f   :  { %3388 = vmatpush1.bf16.msra.mxu0 %v4250_v16 }
  0x70   :  { %3414 = vmatprep.subr.bf16.mxu0 %v4172_v8 }
  0xfd   :  { %v186_v30 = vpop.f32.mrb[0].mxu0 }
  0xfe   :  { %v188_v34 = vpop.f32.mrb[1].mxu0  ;;  %v4321_v63 = vadd.f32 %v186_v30, %v94_v37 }
  0xff   :  { %v4326_v11 = vadd.f32 %v188_v34, %v98_v38 }
 0x101   :  { %v192_v39 = vpop.f32.mrb[2].mxu0 }
 0x102   :  { %v4309_v42 = vadd.f32 %v192_v39, %v94_v37  ;;  %v194_v43 = vpop.f32.mrb[3].mxu0 }
 0x103   :  { %v4311_v46 = vadd.f32 %v194_v43, %v98_v38 }
 0x105   :  { %v2890_v47 = vpop.f32.mrb[4].mxu0 }
 0x106   :  { %v4313_v48 = vadd.f32 %v2890_v47, %v102_v45  ;;  %v263_v51 = vpop.f32.mrb[5].mxu0 }
 0x107   :  { %v4332_v34 = vadd.f32 %v263_v51, %v102_v45 }
 0x122   :  { %v484_v9 = vpop.f32.mrb[0].mxu1 }
 0x123   :  { %v2925_v12 = vpop.f32.mrb[1].mxu1  ;;  %v485_v36 = vadd.f32 %v484_v9, %v4329_v29 }
 0x125   :  { %v413_v61 = vpop.f32.mrb[6].mxu0 }
 0x126   :  { %v414_v2 = vadd.f32 %v413_v61, %v4317_v57  ;;  %v415_v3 = vpop.f32.mrb[7].mxu0 }
 0x127   :  { %v416_v4 = vadd.f32 %v415_v3, %v4319_v60 }
 0x128   :  { %v488_v7 = vadd.f32 %v414_v2, %v4321_v63 }
 0x129   :  { %v495_v18 = vadd.f32 %v416_v4, %v4326_v11 }
 0x12a   :  { %v2664_v17 = vmul.f32 -1.442695, %v488_v7 }
 0x12b   :  { %v2665_v20 = vmul.f32 -1.442695, %v495_v18 }
 0x12c   :  { %3895 = vpow2.f32 %v2664_v17 }
 0x12d   :  { %3897 = vpow2.f32 %v2665_v20 }
 0x136   :  { %v3896_v23 = vpop.eup %3895 }
 0x137   :  { %v492_v25 = vadd.f32 1.0, %v3896_v23  ;;  %v3898_v30 = vpop.eup %3897 }
 0x138   :  { %v499_v33 = vadd.f32 1.0, %v3898_v30 }
 0x139   :  { %3899 = vrcp.f32 %v492_v25 }
 0x13a   :  { %3901 = vrcp.f32 %v499_v33 }
 0x143   :  { %v3900_v37 = vpop.eup %3899 }
 0x144   :  { %v502_v38 = vmul.f32 %v3900_v37, %v485_v36  ;;  %v3902_v43 = vpop.eup %3901 }
 0x145   :  { %v505_v47 = vsub.f32 1.0, %v3902_v43  ;;  %v507_v28 = vmul.f32 0.0, %v3902_v43 }
 0x146   :  { %v503_v39 = vadd.f32 %v502_v38, %v4332_v34 }
 0x148   :  { %3903 = vtanh.f32 %v503_v39 }
 0x152   :  { %v3904_v54 = vpop.eup %3903 }
 0x153   :  { %v506_v55 = vmul.f32 %v3904_v54, %v505_v47 }
 0x155   :  { %v4335_v56 = vadd.f32 %v507_v28, %v506_v55 }
 0x157   :  { %574 = vmatmul.mubr.f32.vlgmr.msra.gmra.mrb[8].mxu0 %v4335_v56  ;;  %2959 = vmatmul.mubr.f32.vlgmr.msra.gmra.mrb[2].mxu1 %v4335_v56  ;;  %v679_v47 = vrot.slane %v4335_v56, 6 }
 0x158   :  { %3416 = vmatpush1.bf16.msra.mxu0 %v4182_v14  ;;  %3447 = vmatpush3.bf16.msra.mxu1 %v4194_v26 }
 0x159   :  { %3418 = vmatprep.subr.bf16.mxu0 %v4184_v15  ;;  %3448 = vmatprep.subr.bf16.mxu1 %v4064_v1 }
 0x15a   :  { %750 = vmatprep.mubr.f32.mxu0 %v4063_v0  ;;  %2993 = vmatprep.mubr.msk.f32.mxu1 %vm4065_vm0, %v4063_v0 }
 0x15c   :  { %3420 = vmatpush1.bf16.msra.mxu0 %v4188_v21  ;;  %3450 = vmatpush3.bf16.msra.mxu1 %v4197_v31 }
 0x15d   :  { %3422 = vmatprep.subr.bf16.mxu0 %v4192_v24  ;;  %3451 = vmatprep.subr.bf16.mxu1 %v4064_v1 }
 0x160   :  { %3424 = vmatpush1.bf16.msra.mxu0 %v4200_v32  ;;  %3453 = vmatpush3.bf16.msra.mxu1 %v4207_v40 }
 0x161   :  { %3426 = vmatprep.subr.bf16.mxu0 %v4204_v35  ;;  %3454 = vmatprep.subr.bf16.mxu1 %v4064_v1 }
 0x164   :  { %3428 = vmatpush1.bf16.msra.mxu0 %v4210_v41  ;;  %3456 = vmatpush3.bf16.msra.mxu1 %v4217_v49 }
 0x165   :  { %3430 = vmatprep.subr.bf16.mxu0 %v4214_v44  ;;  %3457 = vmatprep.subr.bf16.mxu1 %v4064_v1 }
 0x168   :  { %3432 = vmatpush1.bf16.msra.mxu0 %v4220_v50  ;;  %3459 = vmatpush3.bf16.msra.mxu1 %v4227_v58 }
 0x169   :  { %3434 = vmatprep.subr.bf16.mxu0 %v4224_v53  ;;  %3460 = vmatprep.subr.bf16.mxu1 %v4064_v1 }
 0x16c   :  { %3436 = vmatpush1.bf16.msra.mxu0 %v4230_v59  ;;  %3462 = vmatpush3.bf16.msra.mxu1 %v4237_v5 }
 0x16d   :  { %3438 = vmatprep.subr.bf16.mxu0 %v4234_v62  ;;  %3463 = vmatprep.subr.bf16.mxu1 %v4064_v1 }
 0x170   :  { %3440 = vmatpush1.bf16.msra.mxu0 %v4240_v6  ;;  %3465 = vmatpush3.bf16.msra.mxu1 %v4247_v13 }
 0x171   :  { %3442 = vmatprep.subr.bf16.mxu0 %v4244_v10  ;;  %3466 = vmatprep.subr.bf16.mxu1 %v4064_v1 }
 0x174   :  { %3444 = vmatpush1.bf16.msra.mxu0 %v4250_v16  ;;  %3468 = vmatpush3.bf16.msra.mxu1 %v4255_v19 }
 0x175   :  { %3470 = vmatprep.subr.bf16.mxu0 %v4172_v8  ;;  %3501 = vmatprep.subr.bf16.mxu1 %v4064_v1 }
 0x22a   :  { %v575_v45 = vpop.f32.mrb[8].mxu0  ;;  %v646_v51 = vpop.f32.mrb[2].mxu1 }
 0x22b   :  { %v576_v52 = vadd.f32 %v575_v45, %v4317_v57  ;;  %v577_v61 = vpop.f32.mrb[9].mxu0  ;;  %v2960_v2 = vpop.f32.mrb[3].mxu1  ;;  %v647_v27 = vadd.f32 %v646_v51, %v4329_v29 }
 0x22c   :  { %v578_v3 = vadd.f32 %v577_v61, %v4319_v60 }
 0x22d   :  { %v651_v4 = vrot.slane %v576_v52, 6  ;;  %v671_v33 = vrot.slane %v647_v27, 6 }
 0x22e   :  { %v661_v7 = vrot.slane %v578_v3, 6 }
 0x22f   :  { %v653_v9 = vadd.f32 %v651_v4, %v4321_v63 }
 0x230   :  { %v663_v17 = vadd.f32 %v661_v7, %v4326_v11 }
 0x231   :  { %v2666_v12 = vmul.f32 -1.442695, %v653_v9 }
 0x232   :  { %v2667_v18 = vmul.f32 -1.442695, %v663_v17 }
 0x233   :  { %3905 = vpow2.f32 %v2666_v12 }
 0x234   :  { %3907 = vpow2.f32 %v2667_v18 }
 0x23d   :  { %v3906_v20 = vpop.eup %3905 }
 0x23e   :  { %v657_v23 = vadd.f32 1.0, %v3906_v20  ;;  %v3908_v25 = vpop.eup %3907 }
 0x23f   :  { %v667_v30 = vadd.f32 1.0, %v3908_v25 }
 0x240   :  { %3909 = vrcp.f32 %v657_v23 }
 0x241   :  { %3911 = vrcp.f32 %v667_v30 }
 0x24a   :  { %v3910_v36 = vpop.eup %3909 }
 0x24b   :  { %v673_v37 = vmul.f32 %v3910_v36, %v671_v33  ;;  %v3912_v39 = vpop.eup %3911 }
 0x24c   :  { %v676_v43 = vsub.f32 1.0, %v3912_v39  ;;  %v681_v28 = vmul.f32 %v3912_v39, %v679_v47 }
 0x24d   :  { %v674_v38 = vadd.f32 %v673_v37, %v4332_v34 }
 0x24f   :  { %3913 = vtanh.f32 %v674_v38 }
 0x259   :  { %v3914_v54 = vpop.eup %3913 }
 0x25a   :  { %v677_v55 = vmul.f32 %v3914_v54, %v676_v43 }
 0x25c   :  { %v4381_v45 = vadd.f32 %v681_v28, %v677_v55 }
 0x25e   :  { %v4384_v52 = vrot.slane %v4381_v45, 2  ;;  %v855_v39 = vrot.slane %v4381_v45, 6 }
 0x260   :  { %751 = vmatmul.mubr.f32.vlgmr.msra.gmra.mrb[10].mxu0 %v4384_v52  ;;  %2994 = vmatmul.mubr.f32.vlgmr.msra.gmra.mrb[4].mxu1 %v4384_v52 }
 0x261   :  { %3472 = vmatpush1.bf16.msra.mxu0 %v4182_v14  ;;  %3503 = vmatpush3.bf16.msra.mxu1 %v4194_v26 }
 0x262   :  { %3474 = vmatprep.subr.bf16.mxu0 %v4184_v15  ;;  %3504 = vmatprep.subr.bf16.mxu1 %v4064_v1 }
 0x263   :  { %926 = vmatprep.mubr.f32.mxu0 %v4063_v0  ;;  %3028 = vmatprep.mubr.msk.f32.mxu1 %vm4065_vm0, %v4063_v0 }
 0x265   :  { %3476 = vmatpush1.bf16.msra.mxu0 %v4188_v21  ;;  %3506 = vmatpush3.bf16.msra.mxu1 %v4197_v31 }
 0x266   :  { %3478 = vmatprep.subr.bf16.mxu0 %v4192_v24  ;;  %3507 = vmatprep.subr.bf16.mxu1 %v4064_v1 }
 0x269   :  { %3480 = vmatpush1.bf16.msra.mxu0 %v4200_v32  ;;  %3509 = vmatpush3.bf16.msra.mxu1 %v4207_v40 }
 0x26a   :  { %3482 = vmatprep.subr.bf16.mxu0 %v4204_v35  ;;  %3510 = vmatprep.subr.bf16.mxu1 %v4064_v1 }
 0x26d   :  { %3484 = vmatpush1.bf16.msra.mxu0 %v4210_v41  ;;  %3512 = vmatpush3.bf16.msra.mxu1 %v4217_v49 }
 0x26e   :  { %3486 = vmatprep.subr.bf16.mxu0 %v4214_v44  ;;  %3513 = vmatprep.subr.bf16.mxu1 %v4064_v1 }
 0x271   :  { %3488 = vmatpush1.bf16.msra.mxu0 %v4220_v50  ;;  %3515 = vmatpush3.bf16.msra.mxu1 %v4227_v58 }
 0x272   :  { %3490 = vmatprep.subr.bf16.mxu0 %v4224_v53  ;;  %3516 = vmatprep.subr.bf16.mxu1 %v4064_v1 }
 0x275   :  { %3492 = vmatpush1.bf16.msra.mxu0 %v4230_v59  ;;  %3518 = vmatpush3.bf16.msra.mxu1 %v4237_v5 }
 0x276   :  { %3494 = vmatprep.subr.bf16.mxu0 %v4234_v62  ;;  %3519 = vmatprep.subr.bf16.mxu1 %v4064_v1 }
 0x279   :  { %3496 = vmatpush1.bf16.msra.mxu0 %v4240_v6  ;;  %3521 = vmatpush3.bf16.msra.mxu1 %v4247_v13 }
 0x27a   :  { %3498 = vmatprep.subr.bf16.mxu0 %v4244_v10  ;;  %3522 = vmatprep.subr.bf16.mxu1 %v4064_v1 }
 0x27d   :  { %3500 = vmatpush1.bf16.msra.mxu0 %v4250_v16  ;;  %3524 = vmatpush3.bf16.msra.mxu1 %v4255_v19 }
 0x27e   :  { %3526 = vmatprep.subr.bf16.mxu0 %v4172_v8  ;;  %3557 = vmatprep.subr.bf16.mxu1 %v4064_v1 }
 0x333   :  { %v752_v51 = vpop.f32.mrb[10].mxu0  ;;  %v823_v61 = vpop.f32.mrb[4].mxu1 }
 0x334   :  { %v753_v2 = vadd.f32 %v752_v51, %v4317_v57  ;;  %v754_v3 = vpop.f32.mrb[11].mxu0  ;;  %v2995_v4 = vpop.f32.mrb[5].mxu1  ;;  %v824_v36 = vadd.f32 %v823_v61, %v4329_v29  ;;  %v2130_v61 = vrot.slane %v4335_v56, 1 }
 0x335   :  { %v755_v7 = vadd.f32 %v754_v3, %v4319_v60  ;;  %v1774_v3 = vrot.slane %v4381_v45, 1 }
 0x336   :  { %v828_v9 = vrot.slane %v753_v2, 4  ;;  %v848_v37 = vrot.slane %v824_v36, 4 }
 0x337   :  { %v838_v12 = vrot.slane %v755_v7, 4 }
 0x338   :  { %v830_v17 = vadd.f32 %v828_v9, %v4321_v63 }
 0x339   :  { %v840_v18 = vadd.f32 %v838_v12, %v4326_v11 }
 0x33a   :  { %v2668_v20 = vmul.f32 -1.442695, %v830_v17  ;;  %v1788_v17 = vsel %vm1787_vm3, %v4335_v56, %v1774_v3 }
 0x33b   :  { %v2669_v23 = vmul.f32 -1.442695, %v840_v18  ;;  %v2140_v18 = vsel %vm1787_vm3, %v2130_v61, %v4384_v52 }
 0x33c   :  { %3915 = vpow2.f32 %v2668_v20 }
 0x33d   :  { %3917 = vpow2.f32 %v2669_v23 }
 0x346   :  { %v3916_v25 = vpop.eup %3915 }
 0x347   :  { %v3918_v27 = vpop.eup %3917  ;;  %v834_v30 = vadd.f32 1.0, %v3916_v25 }
 0x348   :  { %v844_v33 = vadd.f32 1.0, %v3918_v27 }
 0x349   :  { %3919 = vrcp.f32 %v834_v30 }
 0x34a   :  { %3921 = vrcp.f32 %v844_v33 }
 0x353   :  { %v3920_v38 = vpop.eup %3919 }
 0x354   :  { %v3922_v43 = vpop.eup %3921  ;;  %v850_v47 = vmul.f32 %v3920_v38, %v848_v37 }
 0x355   :  { %v857_v54 = vmul.f32 %v3922_v43, %v855_v39  ;;  %v853_v28 = vsub.f32 1.0, %v3922_v43 }
 0x356   :  { %v851_v55 = vadd.f32 %v850_v47, %v4332_v34 }
 0x358   :  { %3923 = vtanh.f32 %v851_v55 }
 0x362   :  { %v3924_v51 = vpop.eup %3923 }
 0x363   :  { %v854_v2 = vmul.f32 %v3924_v51, %v853_v28 }
 0x365   :  { %v4431_v4 = vadd.f32 %v857_v54, %v854_v2 }
 0x367   :  { %v860_v7 = vrot.slane %v4431_v4, 4  ;;  %v1776_v9 = vrot.slane %v4431_v4, 2  ;;  %v2132_v12 = vrot.slane %v4431_v4, 3  ;;  %v1031_v61 = vrot.slane %v4431_v4, 6 }
 0x369   :  { %927 = vmatmul.mubr.f32.vlgmr.msra.gmra.mrb[12].mxu0 %v860_v7  ;;  %3029 = vmatmul.mubr.f32.vlgmr.msra.gmra.mrb[6].mxu1 %v860_v7  ;;  %v4441_v45 = vsel %vm1789_vm4, %v1788_v17, %v1776_v9  ;;  %v4443_v20 = vsel %vm1789_vm4, %v2140_v18, %v2132_v12 }
 0x36a   :  { %3528 = vmatpush1.bf16.msra.mxu0 %v4182_v14  ;;  %3559 = vmatpush3.bf16.msra.mxu1 %v4194_v26 }
 0x36b   :  { %3530 = vmatprep.subr.bf16.mxu0 %v4184_v15  ;;  %3560 = vmatprep.subr.bf16.mxu1 %v4064_v1 }
 0x36c   :  { %1102 = vmatprep.mubr.f32.mxu0 %v4063_v0  ;;  %3063 = vmatprep.mubr.msk.f32.mxu1 %vm4065_vm0, %v4063_v0 }
 0x36e   :  { %3532 = vmatpush1.bf16.msra.mxu0 %v4188_v21  ;;  %3562 = vmatpush3.bf16.msra.mxu1 %v4197_v31 }
 0x36f   :  { %3534 = vmatprep.subr.bf16.mxu0 %v4192_v24  ;;  %3563 = vmatprep.subr.bf16.mxu1 %v4064_v1 }
 0x372   :  { %3536 = vmatpush1.bf16.msra.mxu0 %v4200_v32  ;;  %3565 = vmatpush3.bf16.msra.mxu1 %v4207_v40 }
 0x373   :  { %3538 = vmatprep.subr.bf16.mxu0 %v4204_v35  ;;  %3566 = vmatprep.subr.bf16.mxu1 %v4064_v1 }
 0x376   :  { %3540 = vmatpush1.bf16.msra.mxu0 %v4210_v41  ;;  %3568 = vmatpush3.bf16.msra.mxu1 %v4217_v49 }
 0x377   :  { %3542 = vmatprep.subr.bf16.mxu0 %v4214_v44  ;;  %3569 = vmatprep.subr.bf16.mxu1 %v4064_v1 }
 0x37a   :  { %3544 = vmatpush1.bf16.msra.mxu0 %v4220_v50  ;;  %3571 = vmatpush3.bf16.msra.mxu1 %v4227_v58 }
 0x37b   :  { %3546 = vmatprep.subr.bf16.mxu0 %v4224_v53  ;;  %3572 = vmatprep.subr.bf16.mxu1 %v4064_v1 }
 0x37e   :  { %3548 = vmatpush1.bf16.msra.mxu0 %v4230_v59  ;;  %3574 = vmatpush3.bf16.msra.mxu1 %v4237_v5 }
 0x37f   :  { %3550 = vmatprep.subr.bf16.mxu0 %v4234_v62  ;;  %3575 = vmatprep.subr.bf16.mxu1 %v4064_v1 }
 0x382   :  { %3552 = vmatpush1.bf16.msra.mxu0 %v4240_v6  ;;  %3577 = vmatpush3.bf16.msra.mxu1 %v4247_v13 }
 0x383   :  { %3554 = vmatprep.subr.bf16.mxu0 %v4244_v10  ;;  %3578 = vmatprep.subr.bf16.mxu1 %v4064_v1 }
 0x386   :  { %3556 = vmatpush1.bf16.msra.mxu0 %v4250_v16  ;;  %3580 = vmatpush3.bf16.msra.mxu1 %v4255_v19 }
 0x387   :  { %3582 = vmatprep.subr.bf16.mxu0 %v4172_v8  ;;  %3613 = vmatprep.subr.bf16.mxu1 %v4064_v1 }
 0x43c   :  { %v928_v56 = vpop.f32.mrb[12].mxu0  ;;  %v999_v52 = vpop.f32.mrb[6].mxu1 }
 0x43d   :  { %v929_v23 = vadd.f32 %v928_v56, %v4317_v57  ;;  %v930_v25 = vpop.f32.mrb[13].mxu0  ;;  %v3030_v27 = vpop.f32.mrb[7].mxu1  ;;  %v1000_v51 = vadd.f32 %v999_v52, %v4329_v29 }
 0x43e   :  { %v931_v30 = vadd.f32 %v930_v25, %v4319_v60 }
 0x43f   :  { %v1004_v33 = vrot.slane %v929_v23, 2  ;;  %v1024_v2 = vrot.slane %v1000_v51, 2 }
 0x440   :  { %v1014_v36 = vrot.slane %v931_v30, 2 }
 0x441   :  { %v1006_v37 = vadd.f32 %v1004_v33, %v4321_v63 }
 0x442   :  { %v1016_v38 = vadd.f32 %v1014_v36, %v4326_v11 }
 0x443   :  { %v2670_v39 = vmul.f32 -1.442695, %v1006_v37 }
 0x444   :  { %v2671_v43 = vmul.f32 -1.442695, %v1016_v38 }
 0x445   :  { %3925 = vpow2.f32 %v2670_v39 }
 0x446   :  { %3927 = vpow2.f32 %v2671_v43 }
 0x44f   :  { %v3926_v47 = vpop.eup %3925 }
 0x450   :  { %v3928_v54 = vpop.eup %3927  ;;  %v1010_v55 = vadd.f32 1.0, %v3926_v47 }
 0x451   :  { %v1020_v28 = vadd.f32 1.0, %v3928_v54 }
 0x452   :  { %3929 = vrcp.f32 %v1010_v55 }
 0x453   :  { %3931 = vrcp.f32 %v1020_v28 }
 0x45c   :  { %v3930_v3 = vpop.eup %3929 }
 0x45d   :  { %v3932_v7 = vpop.eup %3931  ;;  %v1026_v63 = vmul.f32 %v3930_v3, %v1024_v2 }
 0x45e   :  { %v1033_v9 = vmul.f32 %v3932_v7, %v1031_v61  ;;  %v1029_v12 = vsub.f32 1.0, %v3932_v7 }
 0x45f   :  { %v1027_v11 = vadd.f32 %v1026_v63, %v4332_v34 }
 0x461   :  { %3933 = vtanh.f32 %v1027_v11 }
 0x46b   :  { %v3934_v17 = vpop.eup %3933 }
 0x46c   :  { %v1030_v18 = vmul.f32 %v3934_v17, %v1029_v12 }
 0x46e   :  { %v1034_v56 = vadd.f32 %v1033_v9, %v1030_v18 }
 0x470   :  { %v4487_v23 = vrot.slane %v1034_v56, 6  ;;  %v1778_v25 = vrot.slane %v1034_v56, 3  ;;  %v2134_v27 = vrot.slane %v1034_v56, 4 }
 0x472   :  { %1103 = vmatmul.mubr.f32.vlgmr.msra.gmra.mrb[14].mxu0 %v4487_v23  ;;  %3064 = vmatmul.mubr.f32.vlgmr.msra.gmra.mrb[8].mxu1 %v4487_v23  ;;  %v4493_v4 = vsel %vm1791_vm5, %v4441_v45, %v1778_v25  ;;  %v4497_v34 = vsel %vm1791_vm5, %v4443_v20, %v2134_v27 }
 0x473   :  { %3584 = vmatpush1.bf16.msra.mxu0 %v4182_v14  ;;  %3615 = vmatpush3.bf16.msra.mxu1 %v4194_v26 }
 0x474   :  { %3586 = vmatprep.subr.bf16.mxu0 %v4184_v15  ;;  %3616 = vmatprep.subr.bf16.mxu1 %v4064_v1 }
 0x475   :  { %1264 = vmatprep.mubr.f32.mxu0 %v4063_v0  ;;  %3098 = vmatprep.mubr.msk.f32.mxu1 %vm4065_vm0, %v4063_v0 }
 0x477   :  { %3588 = vmatpush1.bf16.msra.mxu0 %v4188_v21  ;;  %3618 = vmatpush3.bf16.msra.mxu1 %v4197_v31 }
 0x478   :  { %3590 = vmatprep.subr.bf16.mxu0 %v4192_v24  ;;  %3619 = vmatprep.subr.bf16.mxu1 %v4064_v1 }
 0x47b   :  { %3592 = vmatpush1.bf16.msra.mxu0 %v4200_v32  ;;  %3621 = vmatpush3.bf16.msra.mxu1 %v4207_v40 }
 0x47c   :  { %3594 = vmatprep.subr.bf16.mxu0 %v4204_v35  ;;  %3622 = vmatprep.subr.bf16.mxu1 %v4064_v1 }
 0x47f   :  { %3596 = vmatpush1.bf16.msra.mxu0 %v4210_v41  ;;  %3624 = vmatpush3.bf16.msra.mxu1 %v4217_v49 }
 0x480   :  { %3598 = vmatprep.subr.bf16.mxu0 %v4214_v44  ;;  %3625 = vmatprep.subr.bf16.mxu1 %v4064_v1 }
 0x483   :  { %3600 = vmatpush1.bf16.msra.mxu0 %v4220_v50  ;;  %3627 = vmatpush3.bf16.msra.mxu1 %v4227_v58 }
 0x484   :  { %3602 = vmatprep.subr.bf16.mxu0 %v4224_v53  ;;  %3628 = vmatprep.subr.bf16.mxu1 %v4064_v1 }
 0x487   :  { %3604 = vmatpush1.bf16.msra.mxu0 %v4230_v59  ;;  %3630 = vmatpush3.bf16.msra.mxu1 %v4237_v5 }
 0x488   :  { %3606 = vmatprep.subr.bf16.mxu0 %v4234_v62  ;;  %3631 = vmatprep.subr.bf16.mxu1 %v4064_v1 }
 0x48b   :  { %3608 = vmatpush1.bf16.msra.mxu0 %v4240_v6  ;;  %3633 = vmatpush3.bf16.msra.mxu1 %v4247_v13 }
 0x48c   :  { %3610 = vmatprep.subr.bf16.mxu0 %v4244_v10  ;;  %3634 = vmatprep.subr.bf16.mxu1 %v4064_v1 }
 0x48f   :  { %3612 = vmatpush1.bf16.msra.mxu0 %v4250_v16  ;;  %3636 = vmatpush3.bf16.msra.mxu1 %v4255_v19 }
 0x490   :  { %3638 = vmatprep.subr.bf16.mxu0 %v4172_v8  ;;  %3669 = vmatprep.subr.bf16.mxu1 %v4064_v1 }
 0x545   :  { %v1104_v45 = vpop.f32.mrb[14].mxu0  ;;  %v1175_v20 = vpop.f32.mrb[8].mxu1 }
 0x546   :  { %v1105_v52 = vadd.f32 %v1104_v45, %v4317_v57  ;;  %v1106_v30 = vpop.f32.mrb[15].mxu0  ;;  %v3065_v33 = vpop.f32.mrb[9].mxu1  ;;  %v1176_v51 = vadd.f32 %v1175_v20, %v4329_v29 }
 0x547   :  { %v1107_v36 = vadd.f32 %v1106_v30, %v4319_v60 }
 0x548   :  { %v1179_v37 = vadd.f32 %v1105_v52, %v4309_v42 }
 0x549   :  { %v1186_v39 = vadd.f32 %v1107_v36, %v4311_v46 }
 0x54a   :  { %v2672_v38 = vmul.f32 -1.442695, %v1179_v37 }
 0x54b   :  { %v2673_v43 = vmul.f32 -1.442695, %v1186_v39 }
 0x54c   :  { %3935 = vpow2.f32 %v2672_v38 }
 0x54d   :  { %3937 = vpow2.f32 %v2673_v43 }
 0x556   :  { %v3936_v47 = vpop.eup %3935 }
 0x557   :  { %v1183_v54 = vadd.f32 1.0, %v3936_v47  ;;  %v3938_v55 = vpop.eup %3937 }
 0x558   :  { %v1190_v28 = vadd.f32 1.0, %v3938_v55 }
 0x559   :  { %3939 = vrcp.f32 %v1183_v54 }
 0x55a   :  { %3941 = vrcp.f32 %v1190_v28 }
 0x563   :  { %v3940_v2 = vpop.eup %3939 }
 0x564   :  { %v1193_v3 = vmul.f32 %v3940_v2, %v1176_v51  ;;  %v3942_v7 = vpop.eup %3941 }
 0x565   :  { %v1196_v63 = vsub.f32 1.0, %v3942_v7  ;;  %v1198_v12 = vmul.f32 %v3942_v7, %v4487_v23 }
 0x566   :  { %v1194_v61 = vadd.f32 %v1193_v3, %v4313_v48 }
 0x568   :  { %3943 = vtanh.f32 %v1194_v61 }
 0x572   :  { %v3944_v9 = vpop.eup %3943 }
 0x573   :  { %v1197_v11 = vmul.f32 %v3944_v9, %v1196_v63 }
 0x575   :  { %v4541_v17 = vadd.f32 %v1198_v12, %v1197_v11 }
 0x577   :  { %1265 = vmatmul.mubr.f32.vlgmr.msra.gmra.mrb[16].mxu0 %v4541_v17  ;;  %3099 = vmatmul.mubr.f32.vlgmr.msra.gmra.mrb[10].mxu1 %v4541_v17  ;;  %v1780_v18 = vrot.slane %v4541_v17, 4  ;;  %v2136_v56 = vrot.slane %v4541_v17, 5  ;;  %v1370_v2 = vrot.slane %v4541_v17, 6 }
 0x578   :  { %3640 = vmatpush1.bf16.msra.mxu0 %v4182_v14  ;;  %3671 = vmatpush3.bf16.msra.mxu1 %v4194_v26 }
 0x579   :  { %3642 = vmatprep.subr.bf16.mxu0 %v4184_v15  ;;  %3672 = vmatprep.subr.bf16.mxu1 %v4064_v1  ;;  %v4552_v23 = vsel %vm1793_vm6, %v4493_v4, %v1780_v18  ;;  %v4555_v25 = vsel %vm1793_vm6, %v4497_v34, %v2136_v56 }
 0x57a   :  { %1441 = vmatprep.mubr.f32.mxu0 %v4063_v0  ;;  %3133 = vmatprep.mubr.msk.f32.mxu1 %vm4065_vm0, %v4063_v0 }
 0x57c   :  { %3644 = vmatpush1.bf16.msra.mxu0 %v4188_v21  ;;  %3674 = vmatpush3.bf16.msra.mxu1 %v4197_v31 }
 0x57d   :  { %3646 = vmatprep.subr.bf16.mxu0 %v4192_v24  ;;  %3675 = vmatprep.subr.bf16.mxu1 %v4064_v1 }
 0x580   :  { %3648 = vmatpush1.bf16.msra.mxu0 %v4200_v32  ;;  %3677 = vmatpush3.bf16.msra.mxu1 %v4207_v40 }
 0x581   :  { %3650 = vmatprep.subr.bf16.mxu0 %v4204_v35  ;;  %3678 = vmatprep.subr.bf16.mxu1 %v4064_v1 }
 0x584   :  { %3652 = vmatpush1.bf16.msra.mxu0 %v4210_v41  ;;  %3680 = vmatpush3.bf16.msra.mxu1 %v4217_v49 }
 0x585   :  { %3654 = vmatprep.subr.bf16.mxu0 %v4214_v44  ;;  %3681 = vmatprep.subr.bf16.mxu1 %v4064_v1 }
 0x588   :  { %3656 = vmatpush1.bf16.msra.mxu0 %v4220_v50  ;;  %3683 = vmatpush3.bf16.msra.mxu1 %v4227_v58 }
 0x589   :  { %3658 = vmatprep.subr.bf16.mxu0 %v4224_v53  ;;  %3684 = vmatprep.subr.bf16.mxu1 %v4064_v1 }
 0x58c   :  { %3660 = vmatpush1.bf16.msra.mxu0 %v4230_v59  ;;  %3686 = vmatpush3.bf16.msra.mxu1 %v4237_v5 }
 0x58d   :  { %3662 = vmatprep.subr.bf16.mxu0 %v4234_v62  ;;  %3687 = vmatprep.subr.bf16.mxu1 %v4064_v1 }
 0x590   :  { %3664 = vmatpush1.bf16.msra.mxu0 %v4240_v6  ;;  %3689 = vmatpush3.bf16.msra.mxu1 %v4247_v13 }
 0x591   :  { %3666 = vmatprep.subr.bf16.mxu0 %v4244_v10  ;;  %3690 = vmatprep.subr.bf16.mxu1 %v4064_v1 }
 0x594   :  { %3668 = vmatpush1.bf16.msra.mxu0 %v4250_v16  ;;  %3692 = vmatpush3.bf16.msra.mxu1 %v4255_v19 }
 0x595   :  { %3694 = vmatprep.subr.bf16.mxu0 %v4172_v8  ;;  %3725 = vmatprep.subr.bf16.mxu1 %v4064_v1 }
 0x64a   :  { %v1266_v27 = vpop.f32.mrb[16].mxu0  ;;  %v1337_v4 = vpop.f32.mrb[10].mxu1 }
 0x64b   :  { %v1267_v34 = vadd.f32 %v1266_v27, %v4317_v57  ;;  %v1268_v45 = vpop.f32.mrb[17].mxu0  ;;  %v3100_v20 = vpop.f32.mrb[11].mxu1  ;;  %v1338_v55 = vadd.f32 %v1337_v4, %v4329_v29 }
 0x64c   :  { %v1269_v52 = vadd.f32 %v1268_v45, %v4319_v60 }
 0x64d   :  { %v1342_v30 = vrot.slane %v1267_v34, 6  ;;  %v1362_v28 = vrot.slane %v1338_v55, 6  ;;  %v1729_v55 = vld [vmem:[#allocation5 + $0x18] sm:$0xff] }
 0x64e   :  { %v1352_v33 = vrot.slane %v1269_v52, 6 }
 0x64f   :  { %v1344_v36 = vadd.f32 %v1342_v30, %v4309_v42 }
 0x650   :  { %v1354_v37 = vadd.f32 %v1352_v33, %v4311_v46 }
 0x651   :  { %v2674_v38 = vmul.f32 -1.442695, %v1344_v36 }
 0x652   :  { %v2675_v39 = vmul.f32 -1.442695, %v1354_v37 }
 0x653   :  { %3945 = vpow2.f32 %v2674_v38 }
 0x654   :  { %3947 = vpow2.f32 %v2675_v39  ;;  %v1727_v39 = vld [vmem:[#allocation5 + $0x8] sm:$0xff] }
 0x65d   :  { %v3946_v8 = vpop.eup %3945 }
 0x65e   :  { %v3948_v43 = vpop.eup %3947  ;;  %v1348_v47 = vadd.f32 1.0, %v3946_v8  ;;  %v1730_v8 = vld [vmem:[#allocation5 + $0x20] sm:$0xff] }
 0x65f   :  { %v1358_v54 = vadd.f32 1.0, %v3948_v43  ;;  %v1728_v43 = vld [vmem:[#allocation5 + $0x10] sm:$0xff] }
 0x660   :  { %3949 = vrcp.f32 %v1348_v47  ;;  %v4661_v47 = vpack.c.bf16 %v1730_v8, %v1727_v39  ;;  %v1759_v39 = vld [vmem:[#allocation5 + $0x108] sm:$0xff] }
 0x661   :  { %3951 = vrcp.f32 %v1358_v54  ;;  %v1726_v54 = vld [vmem:[#allocation5] sm:$0xff] }
 0x66a   :  { %v3950_v51 = vpop.eup %3949 }
 0x66b   :  { %v3952_v3 = vpop.eup %3951  ;;  %v1364_v61 = vmul.f32 %v3950_v51, %v1362_v28  ;;  %v4665_v51 = vpack.c.bf16 %v1729_v55, %v1726_v54  ;;  %v1766_v54 = vld [vmem:[#allocation5 + $0x140] sm:$0xff]  ;;  %v1764_v55 = vld [vmem:[#allocation5 + $0x130] sm:$0xff] }
 0x66c   :  { %v1372_v7 = vmul.f32 %v3952_v3, %v1370_v2  ;;  %v1367_v9 = vsub.f32 1.0, %v3952_v3  ;;  %v1733_v2 = vld [vmem:[#allocation5 + $0x38] sm:$0xff]  ;;  %v1736_v3 = vld [vmem:[#allocation5 + $0x50] sm:$0xff] }
 0x66d   :  { %v1365_v63 = vadd.f32 %v1364_v61, %v4313_v48  ;;  %v1734_v61 = vld [vmem:[#allocation5 + $0x40] sm:$0xff] }
 0x66f   :  { %3953 = vtanh.f32 %v1365_v63  ;;  %v1737_v63 = vld [vmem:[#allocation5 + $0x58] sm:$0xff] }
 0x679   :  { %v3954_v11 = vpop.eup %3953 }
 0x67a   :  { %v1368_v12 = vmul.f32 %v3954_v11, %v1367_v9  ;;  %v1732_v9 = vld [vmem:[#allocation5 + $0x30] sm:$0xff]  ;;  %v1735_v11 = vld [vmem:[#allocation5 + $0x48] sm:$0xff] }
 0x67c   :  { %v4595_v18 = vadd.f32 %v1372_v7, %v1368_v12  ;;  %v4671_v7 = vpack.c.bf16 %v1736_v3, %v1733_v2  ;;  %v4673_v12 = vpack.c.bf16 %v1737_v63, %v1734_v61  ;;  %v1767_v3 = vld [vmem:[#allocation5 + $0x148] sm:$0xff]  ;;  %v1762_v61 = vld [vmem:[#allocation5 + $0x120] sm:$0xff]  ;;  %v1765_v63 = vld [vmem:[#allocation5 + $0x138] sm:$0xff] }
 0x67e   :  { %v1375_v56 = vrot.slane %v4595_v18, 2  ;;  %v1782_v27 = vrot.slane %v4595_v18, 5 }
 0x680   :  { %1442 = vmatmul.mubr.f32.vlgmr.msra.gmra.mrb[18].mxu0 %v1375_v56  ;;  %3134 = vmatmul.mubr.f32.vlgmr.msra.gmra.mrb[12].mxu1 %v1375_v56  ;;  %v4601_v17 = vsel %vm110_vm1, %v4552_v23, %v1782_v27  ;;  %v1546_v23 = vrot.slane %v4595_v18, 6  ;;  %v4675_v18 = vpack.c.bf16 %v1735_v11, %v1732_v9  ;;  %v1739_v56 = vld [vmem:[#allocation5 + $0x68] sm:$0xff]  ;;  %v1742_v27 = vld [vmem:[#allocation5 + $0x80] sm:$0xff]  ;;  %v1769_v9 = vld [vmem:[#allocation5 + $0x158] sm:$0xff] }
 0x681   :  { %3696 = vmatpush1.bf16.msra.mxu0 %v4182_v14  ;;  %3727 = vmatpush3.bf16.msra.mxu1 %v4194_v26  ;;  %v1772_v11 = vld [vmem:[#allocation5 + $0x170] sm:$0xff] }
 0x682   :  { %3698 = vmatprep.subr.bf16.mxu0 %v4184_v15  ;;  %3728 = vmatprep.subr.bf16.mxu1 %v4064_v1  ;;  %v2144_v36 = vsel %vm110_vm1, %v4555_v25, %v1546_v23  ;;  %v1731_v25 = vld [vmem:[#allocation5 + $0x28] sm:$0xff] }
 0x683   :  { %1617 = vmatprep.mubr.f32.mxu0 %v4063_v0  ;;  %3168 = vmatprep.mubr.msk.f32.mxu1 %vm4065_vm0, %v4063_v0  ;;  %v4663_v28 = vpack.c.bf16 %v1731_v25, %v1728_v43  ;;  %v1763_v25 = vld [vmem:[#allocation5 + $0x128] sm:$0xff] }
 0x684   :  { %v4718_v2 = vpack.c.bf16 %v1766_v54, %v1763_v25 }
 0x685   :  { %3700 = vmatpush1.bf16.msra.mxu0 %v4188_v21  ;;  %3730 = vmatpush3.bf16.msra.mxu1 %v4197_v31 }
 0x686   :  { %3702 = vmatprep.subr.bf16.mxu0 %v4192_v24  ;;  %3731 = vmatprep.subr.bf16.mxu1 %v4064_v1 }
 0x689   :  { %3704 = vmatpush1.bf16.msra.mxu0 %v4200_v32  ;;  %3733 = vmatpush3.bf16.msra.mxu1 %v4207_v40 }
 0x68a   :  { %3706 = vmatprep.subr.bf16.mxu0 %v4204_v35  ;;  %3734 = vmatprep.subr.bf16.mxu1 %v4064_v1 }
 0x68d   :  { %3708 = vmatpush1.bf16.msra.mxu0 %v4210_v41  ;;  %3736 = vmatpush3.bf16.msra.mxu1 %v4217_v49 }
 0x68e   :  { %3710 = vmatprep.subr.bf16.mxu0 %v4214_v44  ;;  %3737 = vmatprep.subr.bf16.mxu1 %v4064_v1 }
 0x691   :  { %3712 = vmatpush1.bf16.msra.mxu0 %v4220_v50  ;;  %3739 = vmatpush3.bf16.msra.mxu1 %v4227_v58 }
 0x692   :  { %3714 = vmatprep.subr.bf16.mxu0 %v4224_v53  ;;  %3740 = vmatprep.subr.bf16.mxu1 %v4064_v1 }
 0x695   :  { %3716 = vmatpush1.bf16.msra.mxu0 %v4230_v59  ;;  %3742 = vmatpush3.bf16.msra.mxu1 %v4237_v5 }
 0x696   :  { %3718 = vmatprep.subr.bf16.mxu0 %v4234_v62  ;;  %3743 = vmatprep.subr.bf16.mxu1 %v4064_v1 }
 0x699   :  { %3720 = vmatpush1.bf16.msra.mxu0 %v4240_v6  ;;  %3745 = vmatpush3.bf16.msra.mxu1 %v4247_v13 }
 0x69a   :  { %3722 = vmatprep.subr.bf16.mxu0 %v4244_v10  ;;  %3746 = vmatprep.subr.bf16.mxu1 %v4064_v1 }
 0x69d   :  { %3724 = vmatpush1.bf16.msra.mxu0 %v4250_v16  ;;  %3748 = vmatpush3.bf16.msra.mxu1 %v4255_v19 }
 0x69e   :  { %3781 = vmatprep.subr.bf16.mxu1 %v4064_v1  ;;  %3750 = vmatprep.subr.bf16.mxu0 %v4661_v47 }
 0x753   :  { %v1443_v14 = vpop.f32.mrb[18].mxu0  ;;  %v1514_v15 = vpop.f32.mrb[12].mxu1 }
 0x754   :  { %v1444_v21 = vadd.f32 %v1443_v14, %v4317_v57  ;;  %v1445_v24 = vpop.f32.mrb[19].mxu0  ;;  %v3135_v26 = vpop.f32.mrb[13].mxu1  ;;  %v1515_v59 = vadd.f32 %v1514_v15, %v4329_v29  ;;  %v4681_v14 = vpack.c.bf16 %v1742_v27, %v1739_v56  ;;  %v1743_v15 = vld [vmem:[#allocation5 + $0x88] sm:$0xff]  ;;  %v4722_v56 = vpack.c.bf16 %v1767_v3, %v1764_v55 }
 0x755   :  { %v1446_v31 = vadd.f32 %v1445_v24, %v4319_v60  ;;  %v1741_v24 = vld [vmem:[#allocation5 + $0x78] sm:$0xff]  ;;  %v4724_v27 = vpack.c.bf16 %v1765_v63, %v1762_v61 }
 0x756   :  { %v1519_v32 = vrot.slane %v1444_v21, 4  ;;  %v1539_v5 = vrot.slane %v1515_v59, 4  ;;  %v1738_v21 = vld [vmem:[#allocation5 + $0x60] sm:$0xff]  ;;  %v1751_v59 = vld [vmem:[#allocation5 + $0xc8] sm:$0xff] }
 0x757   :  { %v1529_v35 = vrot.slane %v1446_v31, 4  ;;  %v4685_v31 = vpack.c.bf16 %v1741_v24, %v1738_v21  ;;  %v1773_v21 = vld [vmem:[#allocation5 + $0x178] sm:$0xff]  ;;  %v1768_v24 = vld [vmem:[#allocation5 + $0x150] sm:$0xff] }
 0x758   :  { %v1521_v40 = vadd.f32 %v1519_v32, %v4309_v42  ;;  %v1745_v32 = vld [vmem:[#allocation5 + $0x98] sm:$0xff] }
 0x759   :  { %v1531_v44 = vadd.f32 %v1529_v35, %v4311_v46  ;;  %v1748_v35 = vld [vmem:[#allocation5 + $0xb0] sm:$0xff] }
 0x75a   :  { %v2676_v41 = vmul.f32 -1.442695, %v1521_v40  ;;  %v1746_v40 = vld [vmem:[#allocation5 + $0xa0] sm:$0xff] }
 0x75b   :  { %v2677_v49 = vmul.f32 -1.442695, %v1531_v44  ;;  %v1749_v44 = vld [vmem:[#allocation5 + $0xb8] sm:$0xff] }
 0x75c   :  { %3955 = vpow2.f32 %v2676_v41  ;;  %v4691_v41 = vpack.c.bf16 %v1748_v35, %v1745_v32  ;;  %v1771_v32 = vld [vmem:[#allocation5 + $0x168] sm:$0xff] }
 0x75d   :  { %3957 = vpow2.f32 %v2677_v49  ;;  %v1744_v49 = vld [vmem:[#allocation5 + $0x90] sm:$0xff] }
 0x766   :  { %v3956_v50 = vpop.eup %3955 }
 0x767   :  { %v1525_v53 = vadd.f32 1.0, %v3956_v50  ;;  %v3958_v58 = vpop.eup %3957  ;;  %v1747_v50 = vld [vmem:[#allocation5 + $0xa8] sm:$0xff] }
 0x768   :  { %v1535_v62 = vadd.f32 1.0, %v3958_v58  ;;  %v4695_v58 = vpack.c.bf16 %v1747_v50, %v1744_v49 }
 0x769   :  { %3959 = vrcp.f32 %v1525_v53  ;;  %v4693_v53 = vpack.c.bf16 %v1749_v44, %v1746_v40  ;;  %v4732_v40 = vpack.c.bf16 %v1771_v32, %v1768_v24 }
 0x76a   :  { %3961 = vrcp.f32 %v1535_v62  ;;  %v1754_v62 = vld [vmem:[#allocation5 + $0xe0] sm:$0xff] }
 0x773   :  { %v3960_v6 = vpop.eup %3959 }
 0x774   :  { %v1541_v10 = vmul.f32 %v3960_v6, %v1539_v5  ;;  %v3962_v16 = vpop.eup %3961  ;;  %v1752_v5 = vld [vmem:[#allocation5 + $0xd0] sm:$0xff]  ;;  %v4701_v6 = vpack.c.bf16 %v1754_v62, %v1751_v59 }
 0x775   :  { %v1544_v19 = vsub.f32 1.0, %v3962_v16  ;;  %v1548_v45 = vmul.f32 %v3962_v16, %v1546_v23  ;;  %v1753_v16 = vld [vmem:[#allocation5 + $0xd8] sm:$0xff] }
 0x776   :  { %v1542_v13 = vadd.f32 %v1541_v10, %v4313_v48  ;;  %v1755_v10 = vld [vmem:[#allocation5 + $0xe8] sm:$0xff] }
 0x778   :  { %3963 = vtanh.f32 %v1542_v13  ;;  %v1750_v13 = vld [vmem:[#allocation5 + $0xc0] sm:$0xff] }
 0x779   :  { %v4705_v23 = vpack.c.bf16 %v1753_v16, %v1750_v13 }
 0x782   :  { %v3964_v4 = vpop.eup %3963 }
 0x783   :  { %v1545_v34 = vmul.f32 %v3964_v4, %v1544_v19  ;;  %v4703_v19 = vpack.c.bf16 %v1755_v10, %v1752_v5  ;;  %v1757_v4 = vld [vmem:[#allocation5 + $0xf8] sm:$0xff] }
 0x785   :  { %v4644_v20 = vadd.f32 %v1548_v45, %v1545_v34  ;;  %v1760_v34 = vld [vmem:[#allocation5 + $0x110] sm:$0xff]  ;;  %v1758_v45 = vld [vmem:[#allocation5 + $0x100] sm:$0xff] }
 0x787   :  { %v1551_v52 = vrot.slane %v4644_v20, 4  ;;  %v1722_v30 = vrot.slane %v4644_v20, 6  ;;  %v2138_v33 = vrot.slane %v4644_v20, 7  ;;  %v1802_v20 = vsub.s32 2, %v4299_v22 }
 0x789   :  { %1618 = vmatmul.mubr.f32.vlgmr.msra.gmra.mrb[20].mxu0 %v1551_v52  ;;  %3169 = vmatmul.mubr.f32.vlgmr.msra.gmra.mrb[14].mxu1 %v1551_v52  ;;  %v4654_v37 = vsel %vm1796_vm7, %v4601_v17, %v1722_v30  ;;  %v4656_v38 = vsel %vm1796_vm7, %v2144_v36, %v2138_v33  ;;  %v1740_v17 = vld [vmem:[#allocation5 + $0x70] sm:$0xff]  ;;  %v4708_v52 = vpack.c.bf16 %v1760_v34, %v1757_v4  ;;  %v1761_v33 = vld [vmem:[#allocation5 + $0x118] sm:$0xff] }
 0x78a   :  { %1891 = vmatprep.mubr.f32.mxu0 %v4063_v0  ;;  %3203 = vmatprep.mubr.msk.f32.mxu1 %vm4065_vm0, %v4063_v0  ;;  %v4683_v26 = vpack.c.bf16 %v1743_v15, %v1740_v17  ;;  %v1756_v36 = vld [vmem:[#allocation5 + $0xf0] sm:$0xff]  ;;  %v4712_v8 = vpack.c.bf16 %v1761_v33, %v1758_v45  ;;  %v1770_v17 = vld [vmem:[#allocation5 + $0x160] sm:$0xff]  ;;  %v4728_v15 = vpack.c.bf16 %v1772_v11, %v1769_v9 }
 0x78b   :  { %3783 = vmatpush3.bf16.msra.mxu1 %v4663_v28  ;;  %3752 = vmatpush1.bf16.msra.mxu0 %v4665_v51  ;;  %v4714_v43 = vpack.c.bf16 %v1759_v39, %v1756_v36  ;;  %v3803_v35 = vpack.c.bf16 %v1773_v21, %v1770_v17 }
 0x78c   :  { %3784 = vmatprep.subr.bf16.mxu1 %v4064_v1  ;;  %3754 = vmatprep.subr.bf16.mxu0 %v4671_v7 }
 0x78f   :  { %3786 = vmatpush3.bf16.msra.mxu1 %v4673_v12  ;;  %3756 = vmatpush1.bf16.msra.mxu0 %v4675_v18 }
 0x790   :  { %3787 = vmatprep.subr.bf16.mxu1 %v4064_v1  ;;  %3758 = vmatprep.subr.bf16.mxu0 %v4681_v14 }
 0x793   :  { %3789 = vmatpush3.bf16.msra.mxu1 %v4683_v26  ;;  %3760 = vmatpush1.bf16.msra.mxu0 %v4685_v31 }
 0x794   :  { %3790 = vmatprep.subr.bf16.mxu1 %v4064_v1  ;;  %3762 = vmatprep.subr.bf16.mxu0 %v4691_v41 }
 0x797   :  { %3792 = vmatpush3.bf16.msra.mxu1 %v4693_v53  ;;  %3764 = vmatpush1.bf16.msra.mxu0 %v4695_v58 }
 0x798   :  { %3793 = vmatprep.subr.bf16.mxu1 %v4064_v1  ;;  %3766 = vmatprep.subr.bf16.mxu0 %v4701_v6 }
 0x79b   :  { %3795 = vmatpush3.bf16.msra.mxu1 %v4703_v19  ;;  %3768 = vmatpush1.bf16.msra.mxu0 %v4705_v23 }
 0x79c   :  { %3796 = vmatprep.subr.bf16.mxu1 %v4064_v1  ;;  %3770 = vmatprep.subr.bf16.mxu0 %v4708_v52 }
 0x79f   :  { %3798 = vmatpush3.bf16.msra.mxu1 %v4712_v8  ;;  %3772 = vmatpush1.bf16.msra.mxu0 %v4714_v43 }
 0x7a0   :  { %3799 = vmatprep.subr.bf16.mxu1 %v4064_v1  ;;  %3774 = vmatprep.subr.bf16.mxu0 %v4718_v2 }
 0x7a3   :  { %3801 = vmatpush3.bf16.msra.mxu1 %v4722_v56  ;;  %3776 = vmatpush1.bf16.msra.mxu0 %v4724_v27 }
 0x7a4   :  { %3802 = vmatprep.subr.bf16.mxu1 %v4064_v1  ;;  %3778 = vmatprep.subr.bf16.mxu0 %v4728_v15 }
 0x7a7   :  { %3804 = vmatpush3.bf16.msra.mxu1 %v3803_v35  ;;  %3780 = vmatpush1.bf16.msra.mxu0 %v4732_v40 }
 0x7a8   :  { %3837 = vmatprep.subr.bf16.mxu1 %v4064_v1  ;;  %3206 = vmatprep.subr.mxu0 %v4063_v0 }
 0x85c   :  { %v1619_v44 = vpop.f32.mrb[20].mxu0  ;;  %v1690_v49 = vpop.f32.mrb[14].mxu1 }
 0x85d   :  { %v1620_v50 = vadd.f32 %v1619_v44, %v4317_v57  ;;  %v1621_v59 = vpop.f32.mrb[21].mxu0  ;;  %v3170_v62 = vpop.f32.mrb[15].mxu1  ;;  %v1691_v57 = vadd.f32 %v1690_v49, %v4329_v29 }
 0x85e   :  { %v1622_v5 = vadd.f32 %v1621_v59, %v4319_v60 }
 0x85f   :  { %v1695_v10 = vrot.slane %v1620_v50, 2  ;;  %v1715_v54 = vrot.slane %v1691_v57, 2  ;;  %v2451_v57 = vld [vmem:[%s4912_s7 + $0x8] sm:$0xff] }
 0x860   :  { %v1705_v13 = vrot.slane %v1622_v5, 2 }
 0x861   :  { %v1697_v16 = vadd.f32 %v1695_v10, %v4309_v42 }
 0x862   :  { %v1707_v4 = vadd.f32 %v1705_v13, %v4311_v46 }
 0x863   :  { %v2678_v34 = vmul.f32 -1.442695, %v1697_v16 }
 0x864   :  { %v2679_v45 = vmul.f32 -1.442695, %v1707_v4 }
 0x865   :  { %3965 = vpow2.f32 %v2678_v34 }
 0x866   :  { %3967 = vpow2.f32 %v2679_v45 }
 0x86f   :  { %v3966_v33 = vpop.eup %3965 }
 0x870   :  { %v3968_v36 = vpop.eup %3967  ;;  %v1701_v39 = vadd.f32 1.0, %v3966_v33 }
 0x871   :  { %v1711_v25 = vadd.f32 1.0, %v3968_v36 }
 0x872   :  { %3969 = vrcp.f32 %v1701_v39 }
 0x873   :  { %3971 = vrcp.f32 %v1711_v25  ;;  %v2450_v25 = vld [vmem:[%s4912_s7] sm:$0xff] }
 0x87c   :  { %v3970_v60 = vpop.eup %3969 }
 0x87d   :  { %v3972_v55 = vpop.eup %3971  ;;  %v1717_v3 = vmul.f32 %v3970_v60, %v1715_v54  ;;  %v2452_v54 = vld [vmem:[%s4912_s7 + $0x10] sm:$0xff]  ;;  %v3862_v60 = vpack.c.bf16 %v2451_v57, %v2450_v25 }
 0x87e   :  { %v1724_v42 = vmul.f32 %v3972_v55, %v1722_v30  ;;  %v1720_v61 = vsub.f32 1.0, %v3972_v55  ;;  %v3985_v30 = vld [vmem:[%s4911_s6] sm:$0x77]  ;;  %v2453_v55 = vld [vmem:[%s4912_s7 + $0x18] sm:$0xff] }
 0x87f   :  { %v1718_v46 = vadd.f32 %v1717_v3, %v4313_v48  ;;  %v1806_v48 = vsub.s32 6, %v4299_v22  ;;  %v3865_v3 = vpack.c.bf16 %v2453_v55, %v2452_v54 }
 0x881   :  { %3973 = vtanh.f32 %v1718_v46  ;;  %v2455_v46 = vld [vmem:[%s4912_s7 + $0x28] sm:$0xff] }
 0x88b   :  { %v3974_v63 = vpop.eup %3973 }
 0x88c   :  { %v1721_v9 = vmul.f32 %v3974_v63, %v1720_v61  ;;  %v2456_v63 = vld [vmem:[%s4912_s7 + $0x30] sm:$0xff] }
 0x88e   :  { %v1725_v11 = vadd.f32 %v1724_v42, %v1721_v9  ;;  %v2454_v42 = vld [vmem:[%s4912_s7 + $0x20] sm:$0xff]  ;;  %v2457_v9 = vld [vmem:[%s4912_s7 + $0x38] sm:$0xff] }
 0x88f   :  { %v3868_v61 = vpack.c.bf16 %v2455_v46, %v2454_v42 }
 0x890   :  { %v1785_v17 = vrot.slane %v1725_v11, 7  ;;  %v4748_v21 = vsel %vm1798_vm8, %v4656_v38, %v1725_v11  ;;  %v1803_v38 = vrot.slane %v3985_v30, %v1802_v20  ;;  %v3871_v11 = vpack.c.bf16 %v2457_v9, %v2456_v63 }
 0x892   :  { %v1799_v29 = vsel %vm1798_vm8, %v4654_v37, %v1785_v17  ;;  %v1807_v37 = vrot.slane %v3985_v30, %v1806_v48  ;;  %v2458_v17 = vld [vmem:[%s4912_s7 + $0x40] sm:$0xff] }
 0x893   :  { %1892 = vmatmul.mubr.f32.vlgmr.msra.gmra.mrb[22].mxu0 %v1799_v29  ;;  %3204 = vmatmul.mubr.f32.vlgmr.msra.gmra.mrb[16].mxu1 %v1799_v29 }
 0x894   :  { %3839 = vmatpush3.bf16.msra.mxu1 %v4663_v28  ;;  %3248 = vmatprep.mubr.msk.f32.mxu1 %vm4065_vm0, %v4063_v0  ;;  %v3986_v28 = vld [vmem:[%s4911_s6 + $0x8] sm:$0x7] }
 0x895   :  { %3840 = vmatprep.subr.bf16.mxu1 %v4064_v1  ;;  %3208 = vmatprep.mubr.msk.f32.mxu0 %vm4065_vm0, %v4063_v0 }
 0x898   :  { %3842 = vmatpush3.bf16.msra.mxu1 %v4673_v12  ;;  %v1811_v12 = vrot.slane %v3986_v28, %v1802_v20 }
 0x899   :  { %3843 = vmatprep.subr.bf16.mxu1 %v4064_v1 }
 0x89a   :  { %v1826_v32 = vrot.slane %v1811_v12, %v1802_v20  ;;  %v2462_v12 = vld [vmem:[%s4912_s7 + $0x60] sm:$0xff] }
 0x89c   :  { %3845 = vmatpush3.bf16.msra.mxu1 %v4683_v26  ;;  %v1822_v26 = vrot.slane %v1807_v37, %v1802_v20  ;;  %v2460_v37 = vld [vmem:[%s4912_s7 + $0x50] sm:$0xff] }
 0x89d   :  { %3846 = vmatprep.subr.bf16.mxu1 %v4064_v1 }
 0x8a0   :  { %3848 = vmatpush3.bf16.msra.mxu1 %v4693_v53 }
 0x8a1   :  { %3849 = vmatprep.subr.bf16.mxu1 %v4064_v1 }
 0x8a4   :  { %3851 = vmatpush3.bf16.msra.mxu1 %v4703_v19 }
 0x8a5   :  { %3852 = vmatprep.subr.bf16.mxu1 %v4064_v1 }
 0x8a8   :  { %3854 = vmatpush3.bf16.msra.mxu1 %v4712_v8  ;;  %v1818_v8 = vrot.slane %v1803_v38, %v1802_v20  ;;  %v2461_v38 = vld [vmem:[%s4912_s7 + $0x58] sm:$0xff] }
 0x8a9   :  { %3855 = vmatprep.subr.bf16.mxu1 %v4064_v1  ;;  %v3877_v28 = vpack.c.bf16 %v2461_v38, %v2460_v37 }
 0x8ac   :  { %3857 = vmatpush3.bf16.msra.mxu1 %v4722_v56 }
 0x8ad   :  { %3858 = vmatprep.subr.bf16.mxu1 %v4064_v1 }
 0x8b0   :  { %3860 = vmatpush3.bf16.msra.mxu1 %v3803_v35 }
 0x8b1   :  { %3861 = vmatprep.subr.bf16.mxu1 %v4064_v1 }
 0x8b3   :  { %3249 = vmatmul.mubr.f32.vlgmr.msra.gmra.mrb[18].mxu1 %v4748_v21 }
 0x8b4   :  { %3298 = vmatprep.mubr.msk.f32.mxu1 %vm4065_vm0, %v4063_v0  ;;  %3863 = vmatpush3.bf16.msra.mxu1 %v3862_v60 }
 0x8b5   :  { %3864 = vmatprep.subr.bf16.mxu1 %v4064_v1 }
 0x8b8   :  { %3866 = vmatpush3.bf16.msra.mxu1 %v3865_v3 }
 0x8b9   :  { %3867 = vmatprep.subr.bf16.mxu1 %v4064_v1 }
 0x8bc   :  { %3869 = vmatpush3.bf16.msra.mxu1 %v3868_v61 }
 0x8bd   :  { %3870 = vmatprep.subr.bf16.mxu1 %v4064_v1 }
 0x8c0   :  { %3872 = vmatpush3.bf16.msra.mxu1 %v3871_v11 }
 0x8c1   :  { %3873 = vmatprep.subr.bf16.mxu1 %v4064_v1 }
 0x966   :  { %v1893_v53 = vpop.f32.mrb[22].mxu0  ;;  %v1964_v19 = vpop.f32.mrb[16].mxu1 }
 0x967   :  { %v1895_v56 = vpop.f32.mrb[23].mxu0  ;;  %v3205_v24 = vpop.f32.mrb[17].mxu1  ;;  %v1894_v22 = vadd.f32 %v1893_v53, %v1818_v8  ;;  %v1965_v44 = vadd.f32 %v1964_v19, %v1826_v32  ;;  %v2464_v53 = vld [vmem:[%s4912_s7 + $0x70] sm:$0xff]  ;;  %v2465_v19 = vld [vmem:[%s4912_s7 + $0x78] sm:$0xff] }
 0x968   :  { %v1896_v35 = vadd.f32 %v1895_v56, %v1822_v26  ;;  %v2467_v56 = vld [vmem:[%s4913_s8] sm:$0x7] }
 0x969   :  { %v2466_v24 = vld [vmem:[%s4906_s1] sm:$0x3] }
 0x96a   :  { %3207 = vmatpush3.xpose.msra.mxu0 %v1896_v35 }
 0x96b   :  { %3211 = vmatprep.subr.mxu0 %v4063_v0 }
 0x96d   :  { %3209 = vmatmul.mubr.f32.vlgmr.msra.gmra.mrb[24].mxu0 %v1894_v22 }
 0x96e   :  { %3212 = vmatpush3.msra.mxu0 %v1965_v44  ;;  %3213 = vmatprep.mubr.msk.f32.mxu0 %vm4065_vm0, %v4063_v0 }
 0x96f   :  { %3806 = vmatprep.subr.bf16.mxu0 %v4661_v47 }
 0x986   :  { %v2284_v49 = vpop.f32.mrb[18].mxu1 }
 0x987   :  { %v2285_v50 = vadd.f32 %v2284_v49, %v1826_v32  ;;  %v3250_v59 = vpop.f32.mrb[19].mxu1  ;;  %v4066_v32 = vmov 0  }
 0x988   :  { %3894 = vset.pattern.permute.xlu0 %v4066_v32 }
 0xa40   :  { %v2034_v62 = vpop.f32.mrb[24].mxu0 }
 0xa41   :  { %v2038_v5 = vmul.f32 0.15811388, %v2034_v62  ;;  %v3210_v10 = vpop.f32.mrb[25].mxu0 }
 0xa43   :  { %v2040_v13 = vsel %vm2039_vm9, %v2038_v5, -inf }
 0xa44   :  { %2041 = vmax.xlane.f32.xlu0 %v2040_v13 }
 0xad1   :  { %v2042_v16 = vpop.xlane.xlu0 %2041 }
 0xad2   :  { %v2043_v4 = vsub.f32 %v2038_v5, %v2042_v16 }
 0xad4   :  { %v2044_v34 = vmul.f32 1.442695, %v2043_v4 }
 0xad6   :  { %3975 = vpow2.f32 %v2044_v34 }
 0xae0   :  { %v3976_v45 = vpop.eup %3975 }
 0xae1   :  { %v2046_v33 = vsel %vm2039_vm9, %v3976_v45, 0.0 }
 0xae2   :  { %2047 = vadd.xlane.f32.xlu0 %v2046_v33 }
 0xb6f   :  { %v2048_v36 = vpop.xlane.xlu0 %2047 }
 0xb70   :  { %3977 = vrcp.f32 %v2048_v36 }
 0xb7a   :  { %v3978_v47 = vpop.eup %3977 }
 0xb7b   :  { %v2050_v39 = vmul.f32 %v3978_v47, %v3976_v45 }
 0xb7d   :  { %3214 = vmatmul.mubr.msk.f32.vlgmr.msra.gmra.mrb[26].mxu0 %vm2039_vm9, %v2050_v39  ;;  %v2685_v39 = vld [vmem:[%s4914_s9] ss:$0 sm:$0xff] }
 0xb7e   :  { %3808 = vmatpush1.bf16.msra.mxu0 %v4665_v51  ;;  %2211 = vmatprep.mubr.f32.mxu0 %v4063_v0 }
 0xb7f   :  { %3810 = vmatprep.subr.bf16.mxu0 %v4671_v7 }
 0xb82   :  { %3812 = vmatpush1.bf16.msra.mxu0 %v4675_v18 }
 0xb83   :  { %3814 = vmatprep.subr.bf16.mxu0 %v4681_v14 }
 0xb86   :  { %3816 = vmatpush1.bf16.msra.mxu0 %v4685_v31 }
 0xb87   :  { %3818 = vmatprep.subr.bf16.mxu0 %v4691_v41 }
 0xb8a   :  { %3820 = vmatpush1.bf16.msra.mxu0 %v4695_v58 }
 0xb8b   :  { %3822 = vmatprep.subr.bf16.mxu0 %v4701_v6 }
 0xb8e   :  { %3824 = vmatpush1.bf16.msra.mxu0 %v4705_v23 }
 0xb8f   :  { %3826 = vmatprep.subr.bf16.mxu0 %v4708_v52 }
 0xb92   :  { %3828 = vmatpush1.bf16.msra.mxu0 %v4714_v43 }
 0xb93   :  { %3830 = vmatprep.subr.bf16.mxu0 %v4718_v2 }
 0xb96   :  { %3832 = vmatpush1.bf16.msra.mxu0 %v4724_v27 }
 0xb97   :  { %3834 = vmatprep.subr.bf16.mxu0 %v4728_v15 }
 0xb9a   :  { %3836 = vmatpush1.bf16.msra.mxu0 %v4732_v40 }
 0xb9b   :  { %3251 = vmatprep.subr.mxu0 %v4063_v0 }
 0xb9d   :  { %2212 = vmatmul.mubr.f32.vlgmr.msra.gmra.mrb[28].mxu0 %v4748_v21  ;;  %v2459_v21 = vld [vmem:[%s4912_s7 + $0x48] sm:$0xff] }
 0xb9e   :  { %3253 = vmatprep.mubr.msk.f32.mxu0 %vm4065_vm0, %v4063_v0  ;;  %v3874_v29 = vpack.c.bf16 %v2459_v21, %v2458_v17 }
 0xba0   :  { %3875 = vmatpush3.bf16.msra.mxu1 %v3874_v29 }
 0xba1   :  { %3876 = vmatprep.subr.bf16.mxu1 %v4064_v1 }
 0xba4   :  { %3878 = vmatpush3.bf16.msra.mxu1 %v3877_v28 }
 0xba5   :  { %3879 = vmatprep.subr.bf16.mxu1 %v4064_v1 }
 0xc50   :  { %v4808_v51 = vpop.f32.mrb[26].mxu0 }
 0xc51   :  { %v3215_v7 = vpop.f32.mrb[27].mxu0  ;;  %v2124_v35 = vrot.slane %v4808_v51, 4 }
 0xc53   :  { %v2125_v22 = vadd.f32 %v2124_v35, %v4808_v51 }
 0xc55   :  { %v2126_v44 = vrot.slane %v2125_v22, 2 }
 0xc57   :  { %v2127_v62 = vadd.f32 %v2126_v44, %v2125_v22 }
 0xc59   :  { %v2128_v13 = vrot.slane %v2127_v62, 1 }
 0xc5b   :  { %v2129_v34 = vadd.f32 %v2128_v13, %v2127_v62 }
 0xc70   :  { %v2213_v18 = vpop.f32.mrb[28].mxu0 }
 0xc71   :  { %v2215_v14 = vpop.f32.mrb[29].mxu0  ;;  %v2214_v41 = vadd.f32 %v2213_v18, %v1818_v8  ;;  %v3883_v8 = vpack.c.bf16 %v2465_v19, %v2464_v53  ;;  %v2684_v18 = vld [vmem:[%s4915_s10] ss:$0 sm:$0xff] }
 0xc72   :  { %v2216_v31 = vadd.f32 %v2215_v14, %v1822_v26 }
 0xc74   :  { %3252 = vmatpush3.xpose.msra.mxu0 %v2216_v31 }
 0xc75   :  { %3256 = vmatprep.subr.mxu0 %v4063_v0 }
 0xc77   :  { %3254 = vmatmul.mubr.f32.vlgmr.msra.gmra.mrb[30].mxu0 %v2214_v41 }
 0xc78   :  { %3257 = vmatpush3.msra.mxu0 %v2285_v50  ;;  %3258 = vmatprep.mubr.msk.f32.mxu0 %vm4065_vm0, %v4063_v0 }
 0xc79   :  { %3261 = vmatprep.subr.mxu0 %v4063_v0 }
 0xd4a   :  { %v2354_v58 = vpop.f32.mrb[30].mxu0 }
 0xd4b   :  { %v2358_v6 = vmul.f32 0.15811388, %v2354_v58  ;;  %v3255_v23 = vpop.f32.mrb[31].mxu0 }
 0xd4d   :  { %v2359_v52 = vsel %vm2039_vm9, %v2358_v6, -inf }
 0xd4e   :  { %2360 = vmax.xlane.f32.xlu1 %v2359_v52 }
 0xddb   :  { %v2361_v43 = vpop.xlane.xlu1 %2360 }
 0xddc   :  { %v2362_v2 = vsub.f32 %v2358_v6, %v2361_v43 }
 0xdde   :  { %v2363_v27 = vmul.f32 1.442695, %v2362_v2 }
 0xde0   :  { %3979 = vpow2.f32 %v2363_v27 }
 0xdea   :  { %v3980_v15 = vpop.eup %3979 }
 0xdeb   :  { %v2365_v40 = vsel %vm2039_vm9, %v3980_v15, 0.0 }
 0xdec   :  { %2366 = vadd.xlane.f32.xlu1 %v2365_v40 }
 0xe79   :  { %v2367_v48 = vpop.xlane.xlu1 %2366 }
 0xe7a   :  { %3981 = vrcp.f32 %v2367_v48 }
 0xe84   :  { %v3982_v20 = vpop.eup %3981 }
 0xe85   :  { %v2369_v30 = vmul.f32 %v3982_v20, %v3980_v15 }
 0xe87   :  { %3259 = vmatmul.mubr.msk.f32.vlgmr.msra.gmra.mrb[32].mxu0 %vm2039_vm9, %v2369_v30 }
 0xe88   :  { %3263 = vmatprep.mubr.msk.f32.mxu0 %vm4065_vm0, %v4063_v0  ;;  %v2463_v0 = vld [vmem:[%s4912_s7 + $0x68] sm:$0xff]  ;;  %3262 = vmatpush3.msk.msra.mxu0 %vm1791_vm5, %v2467_v56 }
 0xe89   :  { %v3880_v26 = vpack.c.bf16 %v2463_v0, %v2462_v12 }
 0xe8b   :  { %3881 = vmatpush3.bf16.msra.mxu1 %v3880_v26  ;;  %3264 = vmatmul.mubr.msk.f32.vlgmr.msra.gmra.mrb[34].mxu0 %vm2468_vm10, %v2466_v24 }
 0xe8c   :  { %3882 = vmatprep.subr.bf16.mxu1 %v4064_v1  ;;  %v2623_v1 = vld [vmem:[%s4907_s2] sm:$0x3] }
 0xe8d   :  { %2627 = vperm.xlu0 %3894, %v2623_v1  }
 0xe8f   :  { %3884 = vmatpush3.bf16.msra.mxu1 %v3883_v8 }
 0xf0c   :  { %v2628_v51 = vpop.permute.xlu0 %2627 }
 0xf0d   :  { %v2636_v41 = vmul.f32 %v2685_v39, %v2628_v51 }
 0xf5a   :  { %v2439_v49 = vpop.f32.mrb[32].mxu0 }
 0xf5b   :  { %v2443_v50 = vrot.slane %v2439_v49, 4  ;;  %v3260_v59 = vpop.f32.mrb[33].mxu0 }
 0xf5d   :  { %v2444_v5 = vadd.f32 %v2443_v50, %v2439_v49 }
 0xf5e   :  { %v2541_v36 = vpop.f32.mrb[34].mxu0 }
 0xf5f   :  { %v2445_v10 = vrot.slane %v2444_v5, 2  ;;  %v3265_v47 = vpop.f32.mrb[35].mxu0 }
 0xf61   :  { %v2446_v16 = vadd.f32 %v2445_v10, %v2444_v5 }
 0xf63   :  { %v2447_v4 = vrot.slane %v2446_v16, 1 }
 0xf65   :  { %v2448_v45 = vadd.f32 %v2447_v4, %v2446_v16 }
 0xf67   :  { %v2449_v33 = vsel %vm1787_vm3, %v2129_v34, %v2448_v45 }
 0xf68   :  { %3299 = vmatmul.mubr.f32.vlgmr.msra.gmra.mrb[20].mxu1 %v2449_v33 }
0x103b   :  { %v2611_v7 = vpop.f32.mrb[20].mxu1 }
0x103c   :  { %v2612_v14 = vadd.f32 %v2611_v7, %v2541_v36  ;;  %v3300_v31 = vpop.f32.mrb[21].mxu1 }
0x103e   :  { %v2622_v58 = vadd.f32 %v2684_v18, %v2612_v14 }
0x1040   :  { %v2637_v6 = vadd.f32 %v2636_v41, %v2622_v58 }
0x1042   :  { %3983 = vtanh.f32 %v2637_v6 }
0x104c   :  { %v3984_v23 = vpop.eup %3983 }
0x104d   :  { %2640 = vst.msk [vmem:[#allocation7] sm:$0x3] %vm2639_vm11, %v3984_v23 }
0x104e   :  { %4042 = shalt.err (!%p4039_p6)
}
0x104f   :  { %s4043_s3 = scalar_lea.hbm %s4916_s11, 32 }
0x1050   :  { %p4044_p7 = scmp.ne.s32.totalorder %s4916_s11, %s4043_s3  ;;  %p4047_p8 = scmp.lt.u32.totalorder %s4043_s3, %s4916_s11 }
0x1052   :  { %p4049_p9 = pnand %p4047_p8, %p4044_p7 }
0x1054   :  { %4052 = shalt.err (!%p4049_p9)
}
0x1055   :  { %2650 = dma.vmem_to_hbm [thread:$0]  %s2648_s12, 32, %s4916_s11, [#allocation4]  }
0x1056   :  { %4057 = dma.done.wait [#allocation4], 32  }
0x1057   :  { %4058 = vsyncadd [#allocation4], 4294967264 }
0x1058   :  { %2654 = vsyncpa [#allocation3], 1 }
0x1059   :  { %2655 = vsyncpa [#allocation6], 1 }
0x105a   :  { %2656 = vsyncpa [#allocation4], 1 }

</bundles_post_ra>
